<compile_context>
chip_gen: v5e
topology: v5e:2x2
jax: 0.10.0
libtpu: 0.0.40
codegen_flags: <defaults>
</compile_context>

<pallas_src>
import functools

import jax
import jax.numpy as jnp
from jax import lax
from jax.experimental import pallas as pl
from jax.experimental.pallas import tpu as pltpu


def _round_up(x, m):
    return -(-x // m) * m


def _perceptual_loss_kernel(pred_ref, targ_ref, w1_ref, b1_ref, w2_ref, b2_ref,
                            out_ref, acc_f_ref, acc_r_ref, *,
                            inv_den_feat, inv_den_rec, compute_dtype):
    t = pl.program_id(1)

    @pl.when(t == 0)
    def _init():
        acc_f_ref[...] = jnp.zeros_like(acc_f_ref)
        acc_r_ref[...] = jnp.zeros_like(acc_r_ref)

    w1 = w1_ref[...]
    b1 = b1_ref[...]
    w2 = w2_ref[...]
    b2 = b2_ref[...]

    def features(x):
        # Conv1d(k=3, pad=1) + ReLU folded into one banded matmul per layer; the zero
        # bands in the weight encode the sequence-boundary zero padding.
        h = jnp.dot(x.astype(compute_dtype), w1,
                    preferred_element_type=jnp.float32) + b1
        h = jnp.maximum(h, 0.0)
        f = jnp.dot(h.astype(compute_dtype), w2,
                    preferred_element_type=jnp.float32) + b2
        return jnp.maximum(f, 0.0)

    pred = pred_ref[...]                         # (TM, L*Cin) f32, one sequence per row
    targ = targ_ref[...]

    f_diff = features(pred) - features(targ)     # (TM, L*C2) f32
    r_diff = pred - targ                         # (TM, L*Cin) f32

    # Lane-wise partial sums: reduce rows per tile, accumulate across the grid in VMEM.
    acc_f_ref[...] += jnp.sum(f_diff * f_diff, axis=0, keepdims=True)
    acc_r_ref[...] += jnp.sum(r_diff * r_diff, axis=0, keepdims=True)

    @pl.when(t == pl.num_programs(1) - 1)
    def _finalize():
        partial = (jnp.sum(acc_f_ref[...]) * inv_den_feat
                   + jnp.sum(acc_r_ref[...]) * inv_den_rec)
        out_ref[...] = jnp.full(out_ref.shape, partial, jnp.float32)


def perceptual_loss(pred_ncl, targ_ncl, w1, b1, w2, b2, *,
                    tile_seqs_target=512, num_cores=2, use_bf16_matmul=True):
    """pred/targ: (N, 2, L); w1: (16, 2, 3); b1: (16,); w2: (32, 16, 3); b2: (32,)."""
    N, c_in, L = pred_ncl.shape
    c1, c2 = w1.shape[0], w2.shape[0]
    assert w1.shape[1] == c_in and w2.shape[1] == c1

    compute_dtype = jnp.bfloat16 if use_bf16_matmul else jnp.float32

    # --- host-side layout: one whole sequence per row, position-major channel-minor ---
    def to_rows(x):
        return jnp.transpose(x, (0, 2, 1)).reshape(N, L * c_in).astype(jnp.float32)

    pred2d = to_rows(pred_ncl)
    targ2d = to_rows(targ_ncl)

    # --- block-banded im2col weight: y_rows = x_rows @ Wb + Bb  (Conv1d k, pad=k//2) ---
    # Wb[l_in*I + c, l_out*O + o] = w[o, c, l_in - l_out + k//2] if |l_in-l_out| <= k//2 else 0
    def banded_weight(w):
        o, i, k = w.shape
        wt = jnp.transpose(w, (2, 1, 0)).astype(jnp.float32)      # (k, i, o)
        l_in = jnp.arange(L)[:, None]
        l_out = jnp.arange(L)[None, :]
        d = l_in - l_out + (k // 2)
        valid = (d >= 0) & (d < k)
        band = jnp.where(valid[:, :, None, None], wt[jnp.clip(d, 0, k - 1)], 0.0)
        return jnp.transpose(band, (0, 2, 1, 3)).reshape(L * i, L * o)

    w1b = banded_weight(w1).astype(compute_dtype)                 # (L*c_in, L*c1)
    w2b = banded_weight(w2).astype(compute_dtype)                 # (L*c1,  L*c2)
    b1b = jnp.tile(b1.astype(jnp.float32), L).reshape(1, L * c1)
    b2b = jnp.tile(b2.astype(jnp.float32), L).reshape(1, L * c2)

    # --- tiling: rows are whole sequences; sublane dim multiple of 8 ---
    num_cores = max(1, int(num_cores))
    target = max(8, (int(tile_seqs_target) // 8) * 8)
    needed = _round_up(-(-N // num_cores), 8)
    seqs_per_tile = min(target, needed)
    num_tiles = _round_up(-(-N // seqs_per_tile), num_cores)
    tiles_per_core = num_tiles // num_cores
    pad_seqs = num_tiles * seqs_per_tile - N
    if pad_seqs:
        # Zero-padded sequences give identical pred/targ features -> contribute exactly 0.
        pred2d = jnp.pad(pred2d, ((0, pad_seqs), (0, 0)))
        targ2d = jnp.pad(targ2d, ((0, pad_seqs), (0, 0)))

    kernel = functools.partial(
        _perceptual_loss_kernel,
        inv_den_feat=1.0 / float(N * c2 * L),    # mean over (N, C2, L)
        inv_den_rec=1.0 / float(N * c_in * L),   # mean over (N, Cin, L)
        compute_dtype=compute_dtype,
    )

    row_spec = pl.BlockSpec((seqs_per_tile, L * c_in),
                            lambda p, t: (p * tiles_per_core + t, 0))

    def full2d(shape):
        return pl.BlockSpec(shape, lambda p, t: (0, 0))

    out = pl.pallas_call(
        kernel,
        out_shape=jax.ShapeDtypeStruct((num_cores, 8, 128), jnp.float32),
        grid=(num_cores, tiles_per_core),
        in_specs=[row_spec, row_spec,
                  full2d(w1b.shape), full2d(b1b.shape),
                  full2d(w2b.shape), full2d(b2b.shape)],
        out_specs=pl.BlockSpec((1, 8, 128), lambda p, t: (p, 0, 0)),
        scratch_shapes=[pltpu.VMEM((1, L * c2), jnp.float32),
                        pltpu.VMEM((1, L * c_in), jnp.float32)],
        compiler_params=pltpu.CompilerParams(
            dimension_semantics=("parallel", "arbitrary")),
    )(pred2d, targ2d, w1b, b1b, w2b, b2b)

    # Per-core partial losses (already scaled by 1/den) summed on the host.
    return jnp.sum(out[:, 0, 0])


def _reference_loss(pred, targ, w1, b1, w2, b2):
    # Pure-JAX reference mirroring the PyTorch module exactly (NCL conv1d, k=3, pad=1).
    def feat(x):
        dn = lax.conv_dimension_numbers(x.shape, w1.shape, ("NCH", "OIH", "NCH"))
        h = lax.conv_general_dilated(x, w1, (1,), [(1, 1)],
                                     dimension_numbers=dn) + b1[None, :, None]
        h = jnp.maximum(h, 0.0)
        dn2 = lax.conv_dimension_numbers(h.shape, w2.shape, ("NCH", "OIH", "NCH"))
        h = lax.conv_general_dilated(h, w2, (1,), [(1, 1)],
                                     dimension_numbers=dn2) + b2[None, :, None]
        return jnp.maximum(h, 0.0)

    fp, ft = feat(pred), feat(targ)
    return jnp.mean((fp - ft) ** 2) + jnp.mean((pred - targ) ** 2)


if __name__ == "__main__":
    key = jax.random.PRNGKey(0)
    k1, k2, k3, k4, k5, k6, k7, k8 = jax.random.split(key, 8)

    N, C_IN, L = 2, 2, 16
    C1, C2, K = 16, 32, 3

    pred = jax.random.normal(k1, (N, C_IN, L), jnp.float32)
    targ = jax.random.normal(k2, (N, C_IN, L), jnp.float32)
    # Deterministic synthetic parameters (shapes match nn.Conv1d in the module).
    w1 = jax.random.normal(k3, (C1, C_IN, K), jnp.float32) * 0.2
    b1 = jax.random.normal(k4, (C1,), jnp.float32) * 0.1
    w2 = jax.random.normal(k5, (C2, C1, K), jnp.float32) * 0.2
    b2 = jax.random.normal(k6, (C2,), jnp.float32) * 0.1

    # 1) f32 matmul path, single tile per core, 2-way parallel axis: tight tolerance.
    loss = perceptual_loss(pred, targ, w1, b1, w2, b2, use_bf16_matmul=False)
    loss = jax.block_until_ready(loss)
    ref = _reference_loss(pred, targ, w1, b1, w2, b2)
    assert jnp.allclose(loss, ref, rtol=1e-4, atol=1e-5), (float(loss), float(ref))

    # 2) Multi-tile + padded-tail path (grid accumulation across the "arbitrary" axis).
    N2 = 35
    pred_b = jax.random.normal(k7, (N2, C_IN, L), jnp.float32)
    targ_b = jax.random.normal(k8, (N2, C_IN, L), jnp.float32)
    loss_b = perceptual_loss(pred_b, targ_b, w1, b1, w2, b2,
                             tile_seqs_target=8, num_cores=2, use_bf16_matmul=False)
    loss_b = jax.block_until_ready(loss_b)
    ref_b = _reference_loss(pred_b, targ_b, w1, b1, w2, b2)
    assert jnp.allclose(loss_b, ref_b, rtol=1e-4, atol=1e-5), (float(loss_b), float(ref_b))

    # 3) Default bf16-matmul path (f32 accumulation): looser tolerance for quantization.
    loss_c = perceptual_loss(pred_b, targ_b, w1, b1, w2, b2,
                             tile_seqs_target=8, num_cores=1)
    loss_c = jax.block_until_ready(loss_c)
    assert jnp.allclose(loss_c, ref_b, rtol=5e-2, atol=1e-3), (float(loss_c), float(ref_b))

    print("KERNEL_OK")
</pallas_src>

<mosaic_0001>
module attributes {stable_mosaic.version = 11 : i64} {
  func.func @_perceptual_loss_kernel(%arg0: i32, %arg1: i32, %arg2: memref<8x32xf32, #tpu.memory_space<vmem>>, %arg3: memref<8x32xf32, #tpu.memory_space<vmem>>, %arg4: memref<32x256xf32, #tpu.memory_space<vmem>>, %arg5: memref<1x256xf32, #tpu.memory_space<vmem>>, %arg6: memref<256x512xf32, #tpu.memory_space<vmem>>, %arg7: memref<1x512xf32, #tpu.memory_space<vmem>>, %arg8: memref<1x8x128xf32, #tpu.memory_space<vmem>>, %arg9: memref<1x512xf32, #tpu.memory_space<vmem>>, %arg10: memref<1x32xf32, #tpu.memory_space<vmem>>) attributes {dimension_semantics = [#tpu.dimension_semantics<parallel>, #tpu.dimension_semantics<arbitrary>], iteration_bounds = array<i64: 2, 1>, scalar_prefetch = 0 : i64, scratch_operands = 2 : i64, tpu.core_type = #tpu.core_type<tc>, window_params = [{transform_indices = @transform_0, window_bounds = array<i64: 8, 32>}, {transform_indices = @transform_1, window_bounds = array<i64: 8, 32>}, {pipeline_mode = #tpu.pipeline_mode<synchronous>, transform_indices = @transform_2, window_bounds = array<i64: 32, 256>}, {pipeline_mode = #tpu.pipeline_mode<synchronous>, transform_indices = @transform_3, window_bounds = array<i64: 1, 256>}, {pipeline_mode = #tpu.pipeline_mode<synchronous>, transform_indices = @transform_4, window_bounds = array<i64: 256, 512>}, {pipeline_mode = #tpu.pipeline_mode<synchronous>, transform_indices = @transform_5, window_bounds = array<i64: 1, 512>}, {transform_indices = @transform_6, window_bounds = array<i64: 1, 8, 128>}]} {
    %c0_i32 = arith.constant 0 : i32
    %0 = arith.cmpi eq, %arg1, %c0_i32 : i32
    %1 = arith.extui %0 : i1 to i32
    %c0_i32_0 = arith.constant 0 : i32
    %2 = arith.cmpi ne, %1, %c0_i32_0 : i32
    scf.if %2 {
      %cst_31 = arith.constant 0.000000e+00 : f32
      %46 = vector.broadcast %cst_31 : f32 to vector<1x512xf32>
      %c0_32 = arith.constant 0 : index
      %c0_33 = arith.constant 0 : index
      %47 = vector.load %arg9[%c0_32, %c0_33] : memref<1x512xf32, #tpu.memory_space<vmem>>, vector<1x512xf32>
      tpu.vector_store %arg9[%c0_32, %c0_33], %46 {strides = array<i32>} : memref<1x512xf32, #tpu.memory_space<vmem>>, vector<1x512xf32>,
      %cst_34 = arith.constant 0.000000e+00 : f32
      %48 = vector.broadcast %cst_34 : f32 to vector<1x32xf32>
      %c0_35 = arith.constant 0 : index
      %c0_36 = arith.constant 0 : index
      %49 = vector.load %arg10[%c0_35, %c0_36] : memref<1x32xf32, #tpu.memory_space<vmem>>, vector<1x32xf32>
      tpu.vector_store %arg10[%c0_35, %c0_36], %48 {strides = array<i32>} : memref<1x32xf32, #tpu.memory_space<vmem>>, vector<1x32xf32>,
    } else {
    }
    %c0 = arith.constant 0 : index
    %c0_1 = arith.constant 0 : index
    %3 = vector.load %arg4[%c0, %c0_1] : memref<32x256xf32, #tpu.memory_space<vmem>>, vector<32x256xf32>
    %c0_2 = arith.constant 0 : index
    %c0_3 = arith.constant 0 : index
    %4 = vector.load %arg5[%c0_2, %c0_3] : memref<1x256xf32, #tpu.memory_space<vmem>>, vector<1x256xf32>
    %c0_4 = arith.constant 0 : index
    %c0_5 = arith.constant 0 : index
    %5 = vector.load %arg6[%c0_4, %c0_5] : memref<256x512xf32, #tpu.memory_space<vmem>>, vector<256x512xf32>
    %c0_6 = arith.constant 0 : index
    %c0_7 = arith.constant 0 : index
    %6 = vector.load %arg7[%c0_6, %c0_7] : memref<1x512xf32, #tpu.memory_space<vmem>>, vector<1x512xf32>
    %c0_8 = arith.constant 0 : index
    %c0_9 = arith.constant 0 : index
    %7 = vector.load %arg2[%c0_8, %c0_9] : memref<8x32xf32, #tpu.memory_space<vmem>>, vector<8x32xf32>
    %c0_10 = arith.constant 0 : index
    %c0_11 = arith.constant 0 : index
    %8 = vector.load %arg3[%c0_10, %c0_11] : memref<8x32xf32, #tpu.memory_space<vmem>>, vector<8x32xf32>
    %cst = arith.constant dense<0.000000e+00> : vector<8x256xf32>
    %9 = tpu.matmul %7, %3, %cst {dimension_numbers = #tpu.dot_dimension_numbers<[1], [0], [0], [1], [0, 0, 1, 1], [], []>} : vector<8x32xf32>, vector<32x256xf32>, vector<8x256xf32> -> vector<8x256xf32>
    %10 = vector.broadcast %4 : vector<1x256xf32> to vector<8x256xf32>
    %11 = arith.addf %9, %10 : vector<8x256xf32>
    %cst_12 = arith.constant 0.000000e+00 : f32
    %12 = vector.broadcast %cst_12 : f32 to vector<8x256xf32>
    %13 = arith.maximumf %11, %12 : vector<8x256xf32>
    %cst_13 = arith.constant dense<0.000000e+00> : vector<8x512xf32>
    %14 = tpu.matmul %13, %5, %cst_13 {dimension_numbers = #tpu.dot_dimension_numbers<[1], [0], [0], [1], [0, 0, 1, 1], [], []>} : vector<8x256xf32>, vector<256x512xf32>, vector<8x512xf32> -> vector<8x512xf32>
    %15 = vector.broadcast %6 : vector<1x512xf32> to vector<8x512xf32>
    %16 = arith.addf %14, %15 : vector<8x512xf32>
    %cst_14 = arith.constant 0.000000e+00 : f32
    %17 = vector.broadcast %cst_14 : f32 to vector<8x512xf32>
    %18 = arith.maximumf %16, %17 : vector<8x512xf32>
    %cst_15 = arith.constant dense<0.000000e+00> : vector<8x256xf32>
    %19 = tpu.matmul %8, %3, %cst_15 {dimension_numbers = #tpu.dot_dimension_numbers<[1], [0], [0], [1], [0, 0, 1, 1], [], []>} : vector<8x32xf32>, vector<32x256xf32>, vector<8x256xf32> -> vector<8x256xf32>
    %20 = vector.broadcast %4 : vector<1x256xf32> to vector<8x256xf32>
    %21 = arith.addf %19, %20 : vector<8x256xf32>
    %cst_16 = arith.constant 0.000000e+00 : f32
    %22 = vector.broadcast %cst_16 : f32 to vector<8x256xf32>
    %23 = arith.maximumf %21, %22 : vector<8x256xf32>
    %cst_17 = arith.constant dense<0.000000e+00> : vector<8x512xf32>
    %24 = tpu.matmul %23, %5, %cst_17 {dimension_numbers = #tpu.dot_dimension_numbers<[1], [0], [0], [1], [0, 0, 1, 1], [], []>} : vector<8x256xf32>, vector<256x512xf32>, vector<8x512xf32> -> vector<8x512xf32>
    %25 = vector.broadcast %6 : vector<1x512xf32> to vector<8x512xf32>
    %26 = arith.addf %24, %25 : vector<8x512xf32>
    %cst_18 = arith.constant 0.000000e+00 : f32
    %27 = vector.broadcast %cst_18 : f32 to vector<8x512xf32>
    %28 = arith.maximumf %26, %27 : vector<8x512xf32>
    %29 = arith.subf %18, %28 : vector<8x512xf32>
    %30 = arith.subf %7, %8 : vector<8x32xf32>
    %c0_19 = arith.constant 0 : index
    %c0_20 = arith.constant 0 : index
    %31 = vector.load %arg9[%c0_19, %c0_20] : memref<1x512xf32, #tpu.memory_space<vmem>>, vector<1x512xf32>
    %32 = arith.mulf %29, %29 : vector<8x512xf32>
    %cst_21 = arith.constant dense<0.000000e+00> : vector<512xf32>
    %33 = vector.multi_reduction <add>, %32, %cst_21 [0] : vector<8x512xf32> to vector<512xf32>
    %34 = vector.shape_cast %33 : vector<512xf32> to vector<1x512xf32>
    %35 = arith.addf %31, %34 : vector<1x512xf32>
    %c0_22 = arith.constant 0 : index
    %c0_23 = arith.constant 0 : index
    %36 = vector.load %arg9[%c0_22, %c0_23] : memref<1x512xf32, #tpu.memory_space<vmem>>, vector<1x512xf32>
    tpu.vector_store %arg9[%c0_22, %c0_23], %35 {strides = array<i32>} : memref<1x512xf32, #tpu.memory_space<vmem>>, vector<1x512xf32>,
    %c0_24 = arith.constant 0 : index
    %c0_25 = arith.constant 0 : index
    %37 = vector.load %arg10[%c0_24, %c0_25] : memref<1x32xf32, #tpu.memory_space<vmem>>, vector<1x32xf32>
    %38 = arith.mulf %30, %30 : vector<8x32xf32>
    %cst_26 = arith.constant dense<0.000000e+00> : vector<32xf32>
    %39 = vector.multi_reduction <add>, %38, %cst_26 [0] : vector<8x32xf32> to vector<32xf32>
    %40 = vector.shape_cast %39 : vector<32xf32> to vector<1x32xf32>
    %41 = arith.addf %37, %40 : vector<1x32xf32>
    %c0_27 = arith.constant 0 : index
    %c0_28 = arith.constant 0 : index
    %42 = vector.load %arg10[%c0_27, %c0_28] : memref<1x32xf32, #tpu.memory_space<vmem>>, vector<1x32xf32>
    tpu.vector_store %arg10[%c0_27, %c0_28], %41 {strides = array<i32>} : memref<1x32xf32, #tpu.memory_space<vmem>>, vector<1x32xf32>,
    %c0_i32_29 = arith.constant 0 : i32
    %43 = arith.cmpi eq, %arg1, %c0_i32_29 : i32
    %44 = arith.extui %43 : i1 to i32
    %c0_i32_30 = arith.constant 0 : i32
    %45 = arith.cmpi ne, %44, %c0_i32_30 : i32
    scf.if %45 {
      %c0_31 = arith.constant 0 : index
      %c0_32 = arith.constant 0 : index
      %46 = vector.load %arg9[%c0_31, %c0_32] : memref<1x512xf32, #tpu.memory_space<vmem>>, vector<1x512xf32>
      %47 = vector.shape_cast %46 : vector<1x512xf32> to vector<1x1x512xf32>
      %cst_33 = arith.constant dense<0.000000e+00> : vector<1xf32>
      %48 = vector.multi_reduction <add>, %47, %cst_33 [1, 2] : vector<1x1x512xf32> to vector<1xf32>
      %49 = vector.shape_cast %48 : vector<1xf32> to vector<1x1x1xf32>
      %50 = vector.extract %49[0, 0, 0] : f32 from vector<1x1x1xf32>
      %cst_34 = arith.constant 9.765625E-4 : f32
      %51 = arith.mulf %50, %cst_34 : f32
      %c0_35 = arith.constant 0 : index
      %c0_36 = arith.constant 0 : index
      %52 = vector.load %arg10[%c0_35, %c0_36] : memref<1x32xf32, #tpu.memory_space<vmem>>, vector<1x32xf32>
      %53 = vector.shape_cast %52 : vector<1x32xf32> to vector<1x1x32xf32>
      %cst_37 = arith.constant dense<0.000000e+00> : vector<1xf32>
      %54 = vector.multi_reduction <add>, %53, %cst_37 [1, 2] : vector<1x1x32xf32> to vector<1xf32>
      %55 = vector.shape_cast %54 : vector<1xf32> to vector<1x1x1xf32>
      %56 = vector.extract %55[0, 0, 0] : f32 from vector<1x1x1xf32>
      %cst_38 = arith.constant 1.562500e-02 : f32
      %57 = arith.mulf %56, %cst_38 : f32
      %58 = arith.addf %51, %57 : f32
      %59 = vector.broadcast %58 : f32 to vector<1x8x128xf32>
      %c0_39 = arith.constant 0 : index
      %c0_40 = arith.constant 0 : index
      %c0_41 = arith.constant 0 : index
      %60 = vector.load %arg8[%c0_39, %c0_40, %c0_41] : memref<1x8x128xf32, #tpu.memory_space<vmem>>, vector<1x8x128xf32>
      tpu.vector_store %arg8[%c0_39, %c0_40, %c0_41], %59 {strides = array<i32>} : memref<1x8x128xf32, #tpu.memory_space<vmem>>, vector<1x8x128xf32>,
    } else {
    }
    return
  }
  func.func @transform_0(%arg0: i32, %arg1: i32) -> (i32, i32) {
    %c1_i32 = arith.constant 1 : i32
    %0 = arith.muli %arg0, %c1_i32 : i32
    %1 = arith.addi %0, %arg1 : i32
    %c0_i32 = arith.constant 0 : i32
    %c0_i32_0 = arith.constant 0 : i32
    return %1, %c0_i32 : i32, i32
  }
  func.func @transform_1(%arg0: i32, %arg1: i32) -> (i32, i32) {
    %c1_i32 = arith.constant 1 : i32
    %0 = arith.muli %arg0, %c1_i32 : i32
    %1 = arith.addi %0, %arg1 : i32
    %c0_i32 = arith.constant 0 : i32
    %c0_i32_0 = arith.constant 0 : i32
    return %1, %c0_i32 : i32, i32
  }
  func.func @transform_2(%arg0: i32, %arg1: i32) -> (i32, i32) {
    %c0_i32 = arith.constant 0 : i32
    %c0_i32_0 = arith.constant 0 : i32
    %c0_i32_1 = arith.constant 0 : i32
    return %c0_i32, %c0_i32_0 : i32, i32
  }
  func.func @transform_3(%arg0: i32, %arg1: i32) -> (i32, i32) {
    %c0_i32 = arith.constant 0 : i32
    %c0_i32_0 = arith.constant 0 : i32
    %c0_i32_1 = arith.constant 0 : i32
    return %c0_i32, %c0_i32_0 : i32, i32
  }
  func.func @transform_4(%arg0: i32, %arg1: i32) -> (i32, i32) {
    %c0_i32 = arith.constant 0 : i32
    %c0_i32_0 = arith.constant 0 : i32
    %c0_i32_1 = arith.constant 0 : i32
    return %c0_i32, %c0_i32_0 : i32, i32
  }
  func.func @transform_5(%arg0: i32, %arg1: i32) -> (i32, i32) {
    %c0_i32 = arith.constant 0 : i32
    %c0_i32_0 = arith.constant 0 : i32
    %c0_i32_1 = arith.constant 0 : i32
    return %c0_i32, %c0_i32_0 : i32, i32
  }
  func.func @transform_6(%arg0: i32, %arg1: i32) -> (i32, i32, i32) {
    %c0_i32 = arith.constant 0 : i32
    %c0_i32_0 = arith.constant 0 : i32
    %c0_i32_1 = arith.constant 0 : i32
    return %arg0, %c0_i32, %c0_i32_0 : i32, i32, i32
  }
}

</mosaic_0001>

<bundles_post_ra>
// kernel: tpu_custom_call.1
= control target key start
LH: loop header
LB: loop body
LE: loop exit
PB: predicated region body
PF: predicated region fallthrough
CT: control target
= control target key end

     0   :  { %s2416_s0 = inlined_call_operand.hbm [shape: f32[16,32], index: 0, kind: input, shape index: {}]   ;;  %s2417_s1 = inlined_call_operand.hbm [shape: f32[16,32], index: 1, kind: input, shape index: {}]   ;;  %s2418_s2 = inlined_call_operand.hbm [shape: f32[32,256], index: 2, kind: input, shape index: {}]   ;;  %s2419_s3 = inlined_call_operand.hbm [shape: f32[1,256], index: 3, kind: input, shape index: {}]   ;;  %s2420_s4 = inlined_call_operand.hbm [shape: f32[256,512], index: 4, kind: input, shape index: {}]   ;;  %s2421_s5 = inlined_call_operand.vmem [shape: f32[1,512], index: 5, kind: input, shape index: {}]   ;;  %s2422_s6 = inlined_call_operand.hbm [shape: f32[2,8,128], index: 6, kind: output, shape index: {}]  }
   0x1   :  { %2508 = sst [smem:[#allocation105_spill]] %s2418_s2 }
   0x2   :  { %2509 = sst [smem:[#allocation106_spill]] %s2419_s3 }
   0x3   :  { %2510 = sst [smem:[#allocation107_spill]] %s2420_s4 }
   0x4   :  { %11 = vsyncpa [#allocation5], 0 }
   0x5   :  { %13 = vsyncpa [#allocation5 + $0x1], 0 }
   0x6   :  { %14 = vsyncpa [#allocation8], 0 }
   0x7   :  { %16 = vsyncpa [#allocation8 + $0x1], 0 }
   0x8   :  { %17 = vsyncpa [#allocation11], 0 }
   0x9   :  { %18 = vsyncpa [#allocation6], 0 }
   0xa   :  { %20 = vsyncpa [#allocation6 + $0x1], 0  ;;  %s1639_s21 = smov 0   ;;  %s1641_s22 = smov 0  }
   0xb   :  { %s1643_s23 = smov 0   ;;  %s1645_s24 = smov 0  }
   0xc   :  { %s1647_s25 = smov 0   ;;  %s1649_s26 = smov 0  }
   0xd LB: > { %2511 = sst [smem:[#allocation19_spill]] %s1582_s23  ;;  %s1670_s27 = sadd.s32 4294967295, %s1594_s26   ;;  %s1594_s26 = sphi %s1649_s26, %s26_s26   ;;  %s1590_s25 = sphi %s1647_s25, %s2693_s25   ;;  %s1586_s24 = sphi %s1645_s24, %s2692_s24   ;;  %s1582_s23 = sphi %s1643_s23, %s2691_s23   ;;  %s1578_s22 = sphi %s1641_s22, %s2695_s22   ;;  %s1574_s21 = sphi %s1639_s21, %s2694_s21  }
   0xe   : > { %2512 = sst [smem:[#allocation20_spill]] %s1590_s25  ;;  %p1219_p0 = scmp.ge.s32.totalorder %s1594_s26, 1 }
   0xf   : > { %p61_p1 = scmp.eq.s32.totalorder %s1670_s27, 0  ;;  %p209_p2 = scmp.lt.s32.totalorder %s1594_s26, 3 }
  0x10   : > { %s2513_s2 = sld [smem:[#allocation105_spill]]  ;;  %s1596_s8 = smov [#allocation9]  }
  0x11   : > { %p1678_p3 = pnand %p1219_p0, %p209_p2  ;;  %s222_s9 = sshll.u32 %s1596_s8, 4  ;;  %s223_s9 = int_to_ptr.vmem [resolvable:$true] %s222_s9 }
  0x12   : > { %p1223_p6 = scmp.ge.s32.totalorder %s1594_s26, 2  ;;  %s2516_s3 = sld [smem:[#allocation106_spill]] }
  0x13   : > { %p1265_p4 = pneg %p1678_p3  ;;  %s1597_s14 = smov 256  }
  0x14   : > { %s1598_s15 = smov 16   ;;  %s1599_s16 = smov [#allocation10]  }
  0x15   : > { %p1686_p5 = pnand %p1265_p4, %p61_p1  ;;  %s237_s17 = sshll.u32 %s1599_s16, 4  ;;  %s238_s17 = int_to_ptr.vmem [resolvable:$true] %s237_s17 }
  0x16   : > { %s220_s30 = sshll.u32 %s2513_s2, 4  ;;  %s2517_s4 = sld [smem:[#allocation107_spill]]  ;;  %s221_s30 = int_to_ptr.hbm [resolvable:$true] %s220_s30 }
  0x17   : > { %1268 = dma.hbm_to_vmem [thread:$0]  (!%p1686_p5), %s221_s30, 1024, %s223_s9, [#allocation8], %s1597_s14, %s1597_s14, %s1598_s15  }
  0x18   : > { %s235_s13 = sshll.u32 %s2516_s3, 4  ;;  %s1600_s28 = smov [#allocation12]   ;;  %s236_s13 = int_to_ptr.hbm [resolvable:$true] %s235_s13 }
  0x19   : > { %1271 = dma.hbm_to_vmem [thread:$0]  (!%p1686_p5), %s236_s13, 32, %s238_s17, [#allocation11]  }
  0x1a   : > { %s248_s29 = sshll.u32 %s1600_s28, 4  ;;  %s1601_s30 = smov 512   ;;  %s249_s29 = int_to_ptr.vmem [resolvable:$true] %s248_s29 }
  0x1b   : > { %s1602_s8 = smov 32   ;;  %s1218_s9 = sadd.s32 4294967294, %s1594_s26  }
  0x1c   : > { %s246_s20 = sshll.u32 %s2517_s4, 4  ;;  %s38_s11 = sadd.s32 1, %s1590_s25  ;;  %s247_s20 = int_to_ptr.hbm [resolvable:$true] %s246_s20 }
  0x1d   : > { %1274 = dma.hbm_to_vmem [thread:$0]  (!%p1686_p5), %s247_s20, 16384, %s249_s29, [#allocation11], %s1601_s30, %s1601_s30, %s1602_s8  }
  0x1e   : > { %s47_s12 = sadd.s32 1, %s1582_s23  ;;  %p40_p7 = scmp.ge.s32.totalorder %s38_s11, 2 }
  0x1f   : > { %p54_p8 = scmp.ne.s32.totalorder %s1582_s23, %s1578_s22  ;;  %p55_p9 = scmp.eq.s32.totalorder %s1594_s26, 0 }
  0x20   : > { %p60_p10 = scmp.ne.s32.totalorder %s1578_s22, %s1574_s21  ;;  %s2697_s11 = smov (%p40_p7, %s38_s11), 0 }
  0x21   : > { %2518 = sst [smem:[#allocation21_spill]] %s2697_s11  ;;  %p1713_p11 = por %p55_p9, %p54_p8 }
  0x22   : > { %p1719_p12 = por %p61_p1, %p60_p10  ;;  %s44_s14 = ssub.s32 %s1590_s25, %s2697_s11 }
  0x23   : > { %p196_p13 = scmp.eq.s32.totalorder %s1670_s27, 1  ;;  %p45_p0 = scmp.eq.s32.totalorder %s44_s14, 0 }
  0x24   : > { %p202_p2 = scmp.eq.s32.totalorder %s1218_s9, 1  ;;  %p1289_p5 = scmp.lt.s32.totalorder %s1594_s26, 2 }
  0x25   : > { %p1726_p4 = por %p196_p13, %p54_p8  ;;  %s265_s18 = sand.u32 1, %s1582_s23  }
  0x26   : > { %s1732_s16 = scalar_select %p45_p0, %s1582_s23, %s47_s12  }
  0x27   : > { %p1734_p7 = por %p202_p2, %p60_p10  ;;  %s1224_s19 = sshll.u32 %s265_s18, 3 }
  0x28   : > { %2522 = sst [smem:[#allocation22_spill]] %s1732_s16  ;;  %s1225_s20 = sshll.u32 %s1590_s25, 3 }
  0x29   : > { %s274_s30 = scalar_lea.hbm %s2416_s0, %s1225_s20  ;;  %s269_s8 = scalar_lea.vmem [#allocation4], %s1224_s19 }
  0x2a   : > { %s278_s9 = sshll.u32 %s269_s8, 4  ;;  %s276_s14 = sshll.u32 %s274_s30, 4  ;;  %s279_s9 = int_to_ptr.vmem [resolvable:$true] %s278_s9  ;;  %s277_s14 = int_to_ptr.hbm [resolvable:$true] %s276_s14 }
  0x2b   : > { %p1276_p8 = pnand %p1289_p5, %p1713_p11  ;;  %s294_s3 = scalar_lea.hbm %s2417_s1, %s1225_s20 }
  0x2c   : > { %s285_s4 = sand.u32 1, %s1594_s26   ;;  %s266_s11 = scalar_lea.sflag [#allocation5], %s265_s18 }
  0x2d   : > { %1278 = dma.hbm_to_vmem [thread:$0]  (!%p1276_p8), %s277_s14, 128, %s279_s9, %s266_s11  }
  0x2e   : > { %s296_s16 = sshll.u32 %s294_s3, 4  ;;  %s289_s25 = scalar_lea.vmem [#allocation7], %s1224_s19  ;;  %s297_s16 = int_to_ptr.hbm [resolvable:$true] %s296_s16 }
  0x2f   : > { %s298_s23 = sshll.u32 %s289_s25, 4  ;;  %s286_s28 = scalar_lea.sflag [#allocation8], %s285_s4  ;;  %s299_s23 = int_to_ptr.vmem [resolvable:$true] %s298_s23 }
  0x30   : > { %1281 = dma.hbm_to_vmem [thread:$0]  (!%p1276_p8), %s297_s16, 128, %s299_s23, %s286_s28  }
  0x31   : > { %307 = sbr.rel (%p1678_p3) target bundleno = 736 (0x2e0), region = 44 }
  0x36   : > { %s1752_s13 = sand.u32 1, %s1578_s22  }
  0x37   : > { %s1755_s2 = sshll.u32 %s1752_s13, 3  ;;  %s310_s11 = scalar_lea.sflag [#allocation5], %s1752_s13 }
  0x38   : > { %s313_s3 = scalar_lea.vmem [#allocation4], %s1755_s2 }
  0x39   : > { %1553 = dma.done.wait (%p1719_p12), %s310_s11, 128  }
  0x3a   : > { %1555 = vsyncadd (%p1719_p12), %s310_s11, 4294967168  ;;  %s319_s4 = sand.u32 1, %s1670_s27   ;;  %s323_s25 = scalar_lea.vmem [#allocation7], %s1755_s2 }
  0x3b   : > { %s320_s23 = scalar_lea.sflag [#allocation8], %s319_s4 }
  0x3c   : > { %1557 = dma.done.wait (%p1719_p12), %s320_s23, 128  }
  0x3d   : > { %1559 = vsyncadd (%p1719_p12), %s320_s23, 4294967168 }
  0x3e   : > { %1561 = dma.done.wait (%p61_p1), [#allocation8], 1024  }
  0x3f   : > { %1563 = vsyncadd (%p61_p1), [#allocation8], 4294966272 }
  0x40   : > { %1565 = dma.done.wait (%p61_p1), [#allocation11], 16416  }
  0x41   : > { %1567 = vsyncadd (%p61_p1), [#allocation11], 4294950880  ;;  %v1777_v0 = vld [vmem:[#allocation9 + $0x30] sm:$0xff]  ;;  %v1779_v1 = vld [vmem:[#allocation9 + $0x38] sm:$0xff]  ;;  %vm531_vm0 = vcmask 261120   ;;  %vm384_vm2 = vcmask 253952  }
  0x42   : > { %v1781_v2 = vld [vmem:[#allocation9 + $0x20] sm:$0xff]  ;;  %547 = vmatpush.msra.mxu0 %v1777_v0  ;;  %567 = vmatpush.msra.mxu1 %v1779_v1  ;;  %v1785_v3 = vld [vmem:[#allocation9 + $0x28] sm:$0xff]  ;;  %v1787_v4 = vld [vmem:[#allocation9 + $0x10] sm:$0xff]  ;;  %vm1002_vm3 = vcmask 1042434   ;;  %vm1000_vm4 = vcmask 1040384   ;;  %vm1004_vm5 = vcmask 1041408  }
  0x43   : > { %v1789_v5 = vld [vmem:[#allocation9 + $0x18] sm:$0xff]  ;;  %v1793_v6 = vld [vmem:[#allocation12 + $0x1e0] sm:$0xff]  ;;  %v1813_v13 = vld [vmem:[#allocation12 + $0x1e8] sm:$0xff]  ;;  %s1240_s10 = sshll.u32 %s1586_s24, 3  ;;  %s372_s29 = scalar_lea.vmem [#allocation13], %s1755_s2 }
  0x44   : > { %548 = vmatpush.msra.mxu0 %v1781_v2  ;;  %568 = vmatpush.msra.mxu1 %v1785_v3  ;;  %v1795_v7 = vld [vmem:[#allocation12 + $0x3e0] sm:$0xff]  ;;  %v1815_v14 = vld [vmem:[#allocation12 + $0x3e8] sm:$0xff]  ;;  %s1081_s20 = scalar_lea.hbm %s2422_s6, %s1240_s10  ;;  %s1083_s30 = sshll.u32 %s372_s29, 4  ;;  %s1084_s30 = int_to_ptr.vmem [resolvable:$true] %s1083_s30 }
  0x45   : > { %v1797_v8 = vld [vmem:[#allocation9] sm:$0xff]  ;;  %v1799_v9 = vld [vmem:[#allocation9 + $0x8] sm:$0xff]  ;;  %586 = vmatpush.msra.mxu2 %v1793_v6  ;;  %606 = vmatpush.msra.mxu3 %v1795_v7  ;;  %s1085_s12 = sshll.u32 %s1081_s20, 4  ;;  %s1071_s11 = scalar_lea.sflag [#allocation6], %s1752_s13  ;;  %s1086_s12 = int_to_ptr.hbm [resolvable:$true] %s1085_s12 }
  0x46   : > { %v1803_v10 = vld [vmem:[#allocation12 + $0x1c0] sm:$0xff]  ;;  %549 = vmatpush.msra.mxu0 %v1787_v4  ;;  %569 = vmatpush.msra.mxu1 %v1789_v5  ;;  %v1829_v17 = vld [vmem:[#allocation12 + $0x1c8] sm:$0xff]  ;;  %s1520_s23 = scalar_lea.hbm %s2422_s6, 16 }
  0x47   : > { %v1809_v11 = vld [vmem:[%s313_s3] sm:$0xff]  ;;  %587 = vmatpush.msra.mxu2 %v1803_v10  ;;  %s1514_s3 = sshra.s32 %s1086_s12, 4  ;;  %s1515_s3 = int_to_ptr.hbm [resolvable:$true] %s1514_s3 }
  0x48   : > { %2524 = vst [vmem:[#allocation23_spill] sm:$0xff] %v1809_v11  ;;  %v1811_v12 = vld [vmem:[#allocation12 + $0x3c0] sm:$0xff]  ;;  %550 = vmatpush.msra.mxu0 %v1797_v8  ;;  %570 = vmatpush.msra.mxu1 %v1799_v9  ;;  %v1831_v18 = vld [vmem:[#allocation12 + $0x3c8] sm:$0xff]  ;;  %s1516_s24 = scalar_lea.hbm %s1515_s3, 8  ;;  %p1521_p10 = scmp.lt.s32.totalorder %s1515_s3, %s2422_s6 }
  0x49   : > { %607 = vmatpush.msra.mxu3 %v1811_v12  ;;  %v1821_v15 = vld [vmem:[#allocation12 + $0x1a0] sm:$0xff]  ;;  %1235 = vmatmul.msk.f32.vlgmr.msra.gmra.mxu0 %vm531_vm0, %v1809_v11  ;;  %v1841_v21 = vld [vmem:[#allocation12 + $0x1a8] sm:$0xff]  ;;  %p1517_p1 = scmp.ne.s32.totalorder %s1515_s3, %s1516_s24  ;;  %p1522_p11 = scmp.lt.s32.totalorder %s1520_s23, %s1516_s24 }
  0x4a   : > { %v1823_v16 = vld [vmem:[#allocation12 + $0x3a0] sm:$0xff]  ;;  %1236 = vmatmul.msk.f32.vlgmr.msra.gmra.mxu1 %vm531_vm0, %v1809_v11  ;;  %626 = vmatpush.msrb.mxu0 %v1813_v13  ;;  %v1843_v22 = vld [vmem:[#allocation12 + $0x3a8] sm:$0xff] }
  0x4b   : > { %646 = vmatpush.msrb.mxu1 %v1815_v14  ;;  %v1835_v19 = vld [vmem:[#allocation12 + $0x180] sm:$0xff]  ;;  %588 = vmatpush.msra.mxu2 %v1821_v15  ;;  %v1853_v25 = vld [vmem:[#allocation12 + $0x188] sm:$0xff]  ;;  %p1518_p3 = pnand %p1517_p1, %p1726_p4  ;;  %p1523_p12 = por %p1522_p11, %p1521_p10 }
  0x4c   : > { %v1837_v20 = vld [vmem:[#allocation12 + $0x380] sm:$0xff]  ;;  %608 = vmatpush.msra.mxu3 %v1823_v16  ;;  %627 = vmatpush.msrb.mxu0 %v1829_v17  ;;  %v1855_v26 = vld [vmem:[#allocation12 + $0x388] sm:$0xff] }
  0x4d   : > { %647 = vmatpush.msrb.mxu1 %v1831_v18  ;;  %v1847_v23 = vld [vmem:[#allocation12 + $0x160] sm:$0xff]  ;;  %589 = vmatpush.msra.mxu2 %v1835_v19  ;;  %v1865_v29 = vld [vmem:[#allocation12 + $0x168] sm:$0xff]  ;;  %p1519_p9 = pneg %p1518_p3 }
  0x4e   : > { %v1849_v24 = vld [vmem:[#allocation12 + $0x360] sm:$0xff]  ;;  %609 = vmatpush.msra.mxu3 %v1837_v20  ;;  %628 = vmatpush.msrb.mxu0 %v1841_v21  ;;  %v1867_v30 = vld [vmem:[#allocation12 + $0x368] sm:$0xff] }
  0x4f   : > { %648 = vmatpush.msrb.mxu1 %v1843_v22  ;;  %v1859_v27 = vld [vmem:[#allocation12 + $0x140] sm:$0xff]  ;;  %590 = vmatpush.msra.mxu2 %v1847_v23  ;;  %v1877_v33 = vld [vmem:[#allocation12 + $0x148] sm:$0xff]  ;;  %p1524_p13 = pnand %p1523_p12, %p1519_p9 }
  0x50   : > { %v1861_v28 = vld [vmem:[#allocation12 + $0x340] sm:$0xff]  ;;  %610 = vmatpush.msra.mxu3 %v1849_v24  ;;  %629 = vmatpush.msrb.mxu0 %v1853_v25  ;;  %v1879_v34 = vld [vmem:[#allocation12 + $0x348] sm:$0xff] }
  0x51   : > { %649 = vmatpush.msrb.mxu1 %v1855_v26  ;;  %v1871_v31 = vld [vmem:[#allocation12 + $0x120] sm:$0xff]  ;;  %591 = vmatpush.msra.mxu2 %v1859_v27  ;;  %v1889_v37 = vld [vmem:[#allocation12 + $0x128] sm:$0xff] }
  0x52   : > { %v1873_v32 = vld [vmem:[#allocation12 + $0x320] sm:$0xff]  ;;  %611 = vmatpush.msra.mxu3 %v1861_v28  ;;  %630 = vmatpush.msrb.mxu0 %v1865_v29  ;;  %v1891_v38 = vld [vmem:[#allocation12 + $0x328] sm:$0xff] }
  0x53   : > { %650 = vmatpush.msrb.mxu1 %v1867_v30  ;;  %v1883_v35 = vld [vmem:[#allocation12 + $0x100] sm:$0xff]  ;;  %592 = vmatpush.msra.mxu2 %v1871_v31  ;;  %v1901_v41 = vld [vmem:[#allocation12 + $0x108] sm:$0xff] }
  0x54   : > { %v1885_v36 = vld [vmem:[#allocation12 + $0x300] sm:$0xff]  ;;  %612 = vmatpush.msra.mxu3 %v1873_v32  ;;  %631 = vmatpush.msrb.mxu0 %v1877_v33  ;;  %v1903_v42 = vld [vmem:[#allocation12 + $0x308] sm:$0xff] }
  0x55   : > { %651 = vmatpush.msrb.mxu1 %v1879_v34  ;;  %v1895_v39 = vld [vmem:[#allocation12 + $0xe0] sm:$0xff]  ;;  %593 = vmatpush.msra.mxu2 %v1883_v35  ;;  %v1913_v45 = vld [vmem:[#allocation12 + $0xe8] sm:$0xff] }
  0x56   : > { %v1897_v40 = vld [vmem:[#allocation12 + $0x2e0] sm:$0xff]  ;;  %613 = vmatpush.msra.mxu3 %v1885_v36  ;;  %632 = vmatpush.msrb.mxu0 %v1889_v37  ;;  %v1915_v46 = vld [vmem:[#allocation12 + $0x2e8] sm:$0xff] }
  0x57   : > { %652 = vmatpush.msrb.mxu1 %v1891_v38  ;;  %v1907_v43 = vld [vmem:[#allocation12 + $0xc0] sm:$0xff]  ;;  %594 = vmatpush.msra.mxu2 %v1895_v39  ;;  %v1925_v49 = vld [vmem:[#allocation12 + $0xc8] sm:$0xff] }
  0x58   : > { %v1909_v44 = vld [vmem:[#allocation12 + $0x2c0] sm:$0xff]  ;;  %614 = vmatpush.msra.mxu3 %v1897_v40  ;;  %633 = vmatpush.msrb.mxu0 %v1901_v41  ;;  %v1927_v50 = vld [vmem:[#allocation12 + $0x2c8] sm:$0xff] }
  0x59   : > { %653 = vmatpush.msrb.mxu1 %v1903_v42  ;;  %v1919_v47 = vld [vmem:[#allocation12 + $0xa0] sm:$0xff]  ;;  %595 = vmatpush.msra.mxu2 %v1907_v43  ;;  %v1937_v53 = vld [vmem:[#allocation12 + $0xa8] sm:$0xff] }
  0x5a   : > { %v1921_v48 = vld [vmem:[#allocation12 + $0x2a0] sm:$0xff]  ;;  %615 = vmatpush.msra.mxu3 %v1909_v44  ;;  %634 = vmatpush.msrb.mxu0 %v1913_v45  ;;  %v1939_v54 = vld [vmem:[#allocation12 + $0x2a8] sm:$0xff] }
  0x5b   : > { %654 = vmatpush.msrb.mxu1 %v1915_v46  ;;  %v1931_v51 = vld [vmem:[#allocation12 + $0x80] sm:$0xff]  ;;  %596 = vmatpush.msra.mxu2 %v1919_v47  ;;  %2525 = vst [vmem:[#allocation24_spill] sm:$0xff] %v1939_v54  ;;  %v1949_v57 = vld [vmem:[#allocation12 + $0x88] sm:$0xff] }
  0x5c   : > { %v1933_v52 = vld [vmem:[#allocation12 + $0x280] sm:$0xff]  ;;  %616 = vmatpush.msra.mxu3 %v1921_v48  ;;  %635 = vmatpush.msrb.mxu0 %v1925_v49  ;;  %2528 = vst [vmem:[#allocation27_spill] sm:$0xff] %v1949_v57  ;;  %v1951_v58 = vld [vmem:[#allocation12 + $0x288] sm:$0xff] }
  0x5d   : > { %655 = vmatpush.msrb.mxu1 %v1927_v50  ;;  %v1943_v55 = vld [vmem:[#allocation12 + $0x60] sm:$0xff]  ;;  %597 = vmatpush.msra.mxu2 %v1931_v51  ;;  %2529 = vst [vmem:[#allocation28_spill] sm:$0xff] %v1951_v58  ;;  %v1961_v61 = vld [vmem:[#allocation12 + $0x68] sm:$0xff] }
  0x5e   : > { %2526 = vst [vmem:[#allocation25_spill] sm:$0xff] %v1943_v55  ;;  %v1945_v56 = vld [vmem:[#allocation12 + $0x260] sm:$0xff]  ;;  %617 = vmatpush.msra.mxu3 %v1933_v52  ;;  %636 = vmatpush.msrb.mxu0 %v1937_v53  ;;  %v1963_v62 = vld [vmem:[#allocation12 + $0x268] sm:$0xff] }
  0x5f   : > { %2527 = vst [vmem:[#allocation26_spill] sm:$0xff] %v1945_v56  ;;  %656 = vmatpush.msrb.mxu1 %v1939_v54  ;;  %v1955_v59 = vld [vmem:[#allocation12 + $0x40] sm:$0xff]  ;;  %598 = vmatpush.msra.mxu2 %v1943_v55  ;;  %v1973_v54 = vld [vmem:[#allocation12 + $0x48] sm:$0xff] }
  0x60   : > { %2530 = vst [vmem:[#allocation29_spill] sm:$0xff] %v1955_v59  ;;  %v1957_v60 = vld [vmem:[#allocation12 + $0x240] sm:$0xff]  ;;  %618 = vmatpush.msra.mxu3 %v1945_v56  ;;  %637 = vmatpush.msrb.mxu0 %v1949_v57  ;;  %v1975_v55 = vld [vmem:[#allocation12 + $0x248] sm:$0xff] }
  0x61   : > { %2531 = vst [vmem:[#allocation30_spill] sm:$0xff] %v1957_v60  ;;  %657 = vmatpush.msrb.mxu1 %v1951_v58  ;;  %v1967_v63 = vld [vmem:[#allocation12 + $0x20] sm:$0xff]  ;;  %599 = vmatpush.msra.mxu2 %v1955_v59  ;;  %v1985_v58 = vld [vmem:[#allocation12 + $0x28] sm:$0xff] }
  0x62   : > { %2532 = vst [vmem:[#allocation31_spill] sm:$0xff] %v1961_v61  ;;  %v1969_v11 = vld [vmem:[#allocation12 + $0x220] sm:$0xff]  ;;  %619 = vmatpush.msra.mxu3 %v1957_v60  ;;  %638 = vmatpush.msrb.mxu0 %v1961_v61  ;;  %v1987_v59 = vld [vmem:[#allocation12 + $0x228] sm:$0xff]  ;;  %v1991_v60 = vld [vmem:[#allocation12 + $0x1f0] sm:$0xff] }
  0x63   : > { %2533 = vst [vmem:[#allocation32_spill] sm:$0xff] %v1963_v62  ;;  %658 = vmatpush.msrb.mxu1 %v1963_v62  ;;  %v1979_v56 = vld [vmem:[#allocation12] sm:$0xff]  ;;  %600 = vmatpush.msra.mxu2 %v1967_v63  ;;  %v1993_v61 = vld [vmem:[#allocation12 + $0x3f0] sm:$0xff]  ;;  %v1997_v62 = vld [vmem:[#allocation12 + $0x8] sm:$0xff] }
  0x64   : > { %2534 = vst [vmem:[#allocation33_spill] sm:$0xff] %v1967_v63  ;;  %v1981_v57 = vld [vmem:[#allocation12 + $0x200] sm:$0xff]  ;;  %620 = vmatpush.msra.mxu3 %v1969_v11  ;;  %639 = vmatpush.msrb.mxu0 %v1973_v54  ;;  %v1999_v63 = vld [vmem:[#allocation12 + $0x208] sm:$0xff] }
  0x65   : > { %2535 = vst [vmem:[#allocation34_spill] sm:$0xff] %v1969_v11  ;;  %659 = vmatpush.msrb.mxu1 %v1975_v55  ;;  %601 = vmatpush.msra.mxu2 %v1979_v56  ;;  %v2003_v11 = vld [vmem:[#allocation12 + $0x1f8] sm:$0xff] }
  0x66   : > { %2536 = vst [vmem:[#allocation35_spill] sm:$0xff] %v1973_v54  ;;  %621 = vmatpush.msra.mxu3 %v1981_v57  ;;  %640 = vmatpush.msrb.mxu0 %v1985_v58  ;;  %v2005_v54 = vld [vmem:[#allocation12 + $0x3f8] sm:$0xff] }
  0x67   : > { %2537 = vst [vmem:[#allocation36_spill] sm:$0xff] %v1975_v55  ;;  %660 = vmatpush.msrb.mxu1 %v1987_v59  ;;  %666 = vmatpush.msrb.mxu2 %v1991_v60  ;;  %v2009_v55 = vld [vmem:[#allocation12 + $0x1d0] sm:$0xff] }
  0x68   : > { %2538 = vst [vmem:[#allocation37_spill] sm:$0xff] %v1979_v56  ;;  %686 = vmatpush.msrb.mxu3 %v1993_v61  ;;  %v2011_v56 = vld [vmem:[#allocation12 + $0x3d0] sm:$0xff]  ;;  %641 = vmatpush.msrb.mxu0 %v1997_v62 }
  0x69   : > { %2539 = vst [vmem:[#allocation38_spill] sm:$0xff] %v1981_v57  ;;  %661 = vmatpush.msrb.mxu1 %v1999_v63  ;;  %v2015_v57 = vld [vmem:[#allocation12 + $0x1d8] sm:$0xff]  ;;  %667 = vmatpush.msrb.mxu2 %v2009_v55 }
  0x6a   : > { %2540 = vst [vmem:[#allocation39_spill] sm:$0xff] %v1985_v58  ;;  %v2017_v58 = vld [vmem:[#allocation12 + $0x3d8] sm:$0xff]  ;;  %706 = vmatpush.msra.mxu0 %v2003_v11  ;;  %687 = vmatpush.msrb.mxu3 %v2011_v56 }
  0x6b   : > { %2541 = vst [vmem:[#allocation40_spill] sm:$0xff] %v1987_v59  ;;  %726 = vmatpush.msra.mxu1 %v2005_v54  ;;  %v2021_v59 = vld [vmem:[#allocation12 + $0x1b0] sm:$0xff] }
  0x6c   : > { %2542 = vst [vmem:[#allocation41_spill] sm:$0xff] %v1991_v60  ;;  %v2023_v60 = vld [vmem:[#allocation12 + $0x3b0] sm:$0xff]  ;;  %707 = vmatpush.msra.mxu0 %v2015_v57  ;;  %668 = vmatpush.msrb.mxu2 %v2021_v59 }
  0x6d   : > { %2543 = vst [vmem:[#allocation42_spill] sm:$0xff] %v1993_v61  ;;  %v2027_v61 = vld [vmem:[#allocation12 + $0x1b8] sm:$0xff]  ;;  %727 = vmatpush.msra.mxu1 %v2017_v58  ;;  %688 = vmatpush.msrb.mxu3 %v2023_v60 }
  0x6e   : > { %2544 = vst [vmem:[#allocation43_spill] sm:$0xff] %v1997_v62  ;;  %v2029_v62 = vld [vmem:[#allocation12 + $0x3b8] sm:$0xff]  ;;  %708 = vmatpush.msra.mxu0 %v2027_v61 }
  0x6f   : > { %2545 = vst [vmem:[#allocation44_spill] sm:$0xff] %v1999_v63  ;;  %v2033_v63 = vld [vmem:[#allocation12 + $0x190] sm:$0xff]  ;;  %728 = vmatpush.msra.mxu1 %v2029_v62 }
  0x70   : > { %2546 = vst [vmem:[#allocation45_spill] sm:$0xff] %v2003_v11  ;;  %v2035_v11 = vld [vmem:[#allocation12 + $0x390] sm:$0xff]  ;;  %669 = vmatpush.msrb.mxu2 %v2033_v63 }
  0x71   : > { %2547 = vst [vmem:[#allocation46_spill] sm:$0xff] %v2005_v54  ;;  %v2039_v54 = vld [vmem:[#allocation12 + $0x198] sm:$0xff]  ;;  %689 = vmatpush.msrb.mxu3 %v2035_v11 }
  0x72   : > { %2548 = vst [vmem:[#allocation47_spill] sm:$0xff] %v2009_v55  ;;  %v2041_v55 = vld [vmem:[#allocation12 + $0x398] sm:$0xff]  ;;  %709 = vmatpush.msra.mxu0 %v2039_v54 }
  0x73   : > { %2549 = vst [vmem:[#allocation48_spill] sm:$0xff] %v2011_v56  ;;  %v2045_v56 = vld [vmem:[#allocation12 + $0x170] sm:$0xff]  ;;  %729 = vmatpush.msra.mxu1 %v2041_v55 }
  0x74   : > { %2550 = vst [vmem:[#allocation49_spill] sm:$0xff] %v2015_v57  ;;  %v2047_v57 = vld [vmem:[#allocation12 + $0x370] sm:$0xff]  ;;  %670 = vmatpush.msrb.mxu2 %v2045_v56 }
  0x75   : > { %2551 = vst [vmem:[#allocation50_spill] sm:$0xff] %v2017_v58  ;;  %v2051_v58 = vld [vmem:[#allocation12 + $0x178] sm:$0xff]  ;;  %690 = vmatpush.msrb.mxu3 %v2047_v57 }
  0x76   : > { %2552 = vst [vmem:[#allocation51_spill] sm:$0xff] %v2021_v59  ;;  %v2053_v59 = vld [vmem:[#allocation12 + $0x378] sm:$0xff]  ;;  %710 = vmatpush.msra.mxu0 %v2051_v58 }
  0x77   : > { %2553 = vst [vmem:[#allocation52_spill] sm:$0xff] %v2023_v60  ;;  %v2057_v60 = vld [vmem:[#allocation12 + $0x150] sm:$0xff]  ;;  %730 = vmatpush.msra.mxu1 %v2053_v59 }
  0x78   : > { %2554 = vst [vmem:[#allocation53_spill] sm:$0xff] %v2027_v61  ;;  %v2059_v61 = vld [vmem:[#allocation12 + $0x350] sm:$0xff]  ;;  %671 = vmatpush.msrb.mxu2 %v2057_v60 }
  0x79   : > { %2555 = vst [vmem:[#allocation54_spill] sm:$0xff] %v2029_v62  ;;  %v2063_v62 = vld [vmem:[#allocation12 + $0x158] sm:$0xff]  ;;  %691 = vmatpush.msrb.mxu3 %v2059_v61 }
  0x7a   : > { %2556 = vst [vmem:[#allocation55_spill] sm:$0xff] %v2033_v63  ;;  %v2065_v63 = vld [vmem:[#allocation12 + $0x358] sm:$0xff]  ;;  %711 = vmatpush.msra.mxu0 %v2063_v62 }
  0x7b   : > { %2557 = vst [vmem:[#allocation56_spill] sm:$0xff] %v2035_v11  ;;  %v2069_v11 = vld [vmem:[#allocation12 + $0x130] sm:$0xff]  ;;  %731 = vmatpush.msra.mxu1 %v2065_v63 }
  0x7c   : > { %2558 = vst [vmem:[#allocation57_spill] sm:$0xff] %v2039_v54  ;;  %v2071_v54 = vld [vmem:[#allocation12 + $0x330] sm:$0xff]  ;;  %672 = vmatpush.msrb.mxu2 %v2069_v11 }
  0x7d   : > { %2559 = vst [vmem:[#allocation58_spill] sm:$0xff] %v2041_v55  ;;  %v2075_v55 = vld [vmem:[#allocation12 + $0x138] sm:$0xff]  ;;  %692 = vmatpush.msrb.mxu3 %v2071_v54 }
  0x7e   : > { %2560 = vst [vmem:[#allocation59_spill] sm:$0xff] %v2045_v56  ;;  %v2077_v56 = vld [vmem:[#allocation12 + $0x338] sm:$0xff]  ;;  %712 = vmatpush.msra.mxu0 %v2075_v55 }
  0x7f   : > { %2561 = vst [vmem:[#allocation60_spill] sm:$0xff] %v2047_v57  ;;  %v2081_v57 = vld [vmem:[#allocation12 + $0x110] sm:$0xff]  ;;  %732 = vmatpush.msra.mxu1 %v2077_v56 }
  0x80   : > { %2562 = vst [vmem:[#allocation61_spill] sm:$0xff] %v2051_v58  ;;  %v2083_v58 = vld [vmem:[#allocation12 + $0x310] sm:$0xff]  ;;  %673 = vmatpush.msrb.mxu2 %v2081_v57 }
  0x81   : > { %2563 = vst [vmem:[#allocation62_spill] sm:$0xff] %v2053_v59  ;;  %v2087_v59 = vld [vmem:[#allocation12 + $0x118] sm:$0xff]  ;;  %693 = vmatpush.msrb.mxu3 %v2083_v58 }
  0x82   : > { %2564 = vst [vmem:[#allocation63_spill] sm:$0xff] %v2057_v60  ;;  %v2089_v60 = vld [vmem:[#allocation12 + $0x318] sm:$0xff]  ;;  %713 = vmatpush.msra.mxu0 %v2087_v59 }
  0x83   : > { %2565 = vst [vmem:[#allocation64_spill] sm:$0xff] %v2059_v61  ;;  %v2093_v61 = vld [vmem:[#allocation12 + $0xf0] sm:$0xff]  ;;  %733 = vmatpush.msra.mxu1 %v2089_v60 }
  0x84   : > { %2566 = vst [vmem:[#allocation65_spill] sm:$0xff] %v2063_v62  ;;  %v2095_v62 = vld [vmem:[#allocation12 + $0x2f0] sm:$0xff]  ;;  %674 = vmatpush.msrb.mxu2 %v2093_v61 }
  0x85   : > { %2567 = vst [vmem:[#allocation66_spill] sm:$0xff] %v2065_v63  ;;  %v2099_v63 = vld [vmem:[#allocation12 + $0xf8] sm:$0xff]  ;;  %694 = vmatpush.msrb.mxu3 %v2095_v62 }
  0x86   : > { %2568 = vst [vmem:[#allocation67_spill] sm:$0xff] %v2069_v11  ;;  %v2101_v11 = vld [vmem:[#allocation12 + $0x2f8] sm:$0xff]  ;;  %714 = vmatpush.msra.mxu0 %v2099_v63 }
  0x87   : > { %2569 = vst [vmem:[#allocation68_spill] sm:$0xff] %v2071_v54  ;;  %734 = vmatpush.msra.mxu1 %v2101_v11 }
  0x88   : > { %2570 = vst [vmem:[#allocation69_spill] sm:$0xff] %v2075_v55  ;;  %v2173_v55 = vld [vmem:[#allocation12 + $0x238] sm:$0xff] }
  0x89   : > { %2571 = vst [vmem:[#allocation70_spill] sm:$0xff] %v2077_v56  ;;  %v2109_v56 = vld [vmem:[#allocation12 + $0xd0] sm:$0xff] }
  0x8a   : > { %2572 = vst [vmem:[#allocation71_spill] sm:$0xff] %v2081_v57  ;;  %v2111_v57 = vld [vmem:[#allocation12 + $0x2d0] sm:$0xff]  ;;  %675 = vmatpush.msrb.mxu2 %v2109_v56 }
  0x8b   : > { %2573 = vst [vmem:[#allocation72_spill] sm:$0xff] %v2083_v58  ;;  %v2113_v58 = vld [vmem:[#allocation12 + $0xd8] sm:$0xff]  ;;  %695 = vmatpush.msrb.mxu3 %v2111_v57 }
  0x8c   : > { %2574 = vst [vmem:[#allocation73_spill] sm:$0xff] %v2087_v59  ;;  %v2117_v59 = vld [vmem:[#allocation12 + $0x2d8] sm:$0xff]  ;;  %715 = vmatpush.msra.mxu0 %v2113_v58 }
  0x8d   : > { %2575 = vst [vmem:[#allocation74_spill] sm:$0xff] %v2089_v60  ;;  %735 = vmatpush.msra.mxu1 %v2117_v59  ;;  %v2165_v60 = vld [vmem:[#allocation12 + $0x30] sm:$0xff] }
  0x8e   : > { %2576 = vst [vmem:[#allocation75_spill] sm:$0xff] %v2093_v61  ;;  %v2129_v61 = vld [vmem:[#allocation12 + $0x2b8] sm:$0xff] }
  0x8f   : > { %2577 = vst [vmem:[#allocation76_spill] sm:$0xff] %v2095_v62  ;;  %v2121_v62 = vld [vmem:[#allocation12 + $0xb0] sm:$0xff]  ;;  %736 = vmatpush.msra.mxu1 %v2129_v61 }
  0x90   : > { %2578 = vst [vmem:[#allocation77_spill] sm:$0xff] %v2099_v63  ;;  %v2123_v63 = vld [vmem:[#allocation12 + $0x2b0] sm:$0xff]  ;;  %676 = vmatpush.msrb.mxu2 %v2121_v62 }
  0x91   : > { %2579 = vst [vmem:[#allocation78_spill] sm:$0xff] %v2101_v11  ;;  %v2125_v11 = vld [vmem:[#allocation12 + $0xb8] sm:$0xff]  ;;  %696 = vmatpush.msrb.mxu3 %v2123_v63 }
  0x92   : > { %2580 = vst [vmem:[#allocation79_spill] sm:$0xff] %v2109_v56  ;;  %716 = vmatpush.msra.mxu0 %v2125_v11  ;;  %v2141_v56 = vld [vmem:[#allocation12 + $0x298] sm:$0xff] }
  0x93   : > { %2581 = vst [vmem:[#allocation80_spill] sm:$0xff] %v2111_v57  ;;  %v2133_v57 = vld [vmem:[#allocation12 + $0x90] sm:$0xff]  ;;  %737 = vmatpush.msra.mxu1 %v2141_v56 }
  0x94   : > { %2582 = vst [vmem:[#allocation81_spill] sm:$0xff] %v2113_v58  ;;  %v2135_v58 = vld [vmem:[#allocation12 + $0x290] sm:$0xff]  ;;  %677 = vmatpush.msrb.mxu2 %v2133_v57 }
  0x95   : > { %2583 = vst [vmem:[#allocation82_spill] sm:$0xff] %v2117_v59  ;;  %v2137_v59 = vld [vmem:[#allocation12 + $0x98] sm:$0xff]  ;;  %697 = vmatpush.msrb.mxu3 %v2135_v58 }
  0x96   : > { %2584 = vst [vmem:[#allocation83_spill] sm:$0xff] %v2121_v62  ;;  %717 = vmatpush.msra.mxu0 %v2137_v59  ;;  %v2153_v62 = vld [vmem:[#allocation12 + $0x278] sm:$0xff] }
  0x97   : > { %2585 = vst [vmem:[#allocation84_spill] sm:$0xff] %v2123_v63  ;;  %v2145_v63 = vld [vmem:[#allocation12 + $0x70] sm:$0xff]  ;;  %738 = vmatpush.msra.mxu1 %v2153_v62 }
  0x98   : > { %2586 = vst [vmem:[#allocation85_spill] sm:$0xff] %v2125_v11  ;;  %v2147_v11 = vld [vmem:[#allocation12 + $0x270] sm:$0xff]  ;;  %678 = vmatpush.msrb.mxu2 %v2145_v63 }
  0x99   : > { %2587 = vst [vmem:[#allocation86_spill] sm:$0xff] %v2129_v61  ;;  %v2149_v61 = vld [vmem:[#allocation12 + $0x78] sm:$0xff]  ;;  %698 = vmatpush.msrb.mxu3 %v2147_v11 }
  0x9a   : > { %2588 = vst [vmem:[#allocation87_spill] sm:$0xff] %v2133_v57  ;;  %v2155_v57 = vld [vmem:[#allocation12 + $0x50] sm:$0xff]  ;;  %718 = vmatpush.msra.mxu0 %v2149_v61 }
  0x9b   : > { %2589 = vst [vmem:[#allocation88_spill] sm:$0xff] %v2135_v58  ;;  %v2157_v58 = vld [vmem:[#allocation12 + $0x250] sm:$0xff]  ;;  %679 = vmatpush.msrb.mxu2 %v2155_v57 }
  0x9c   : > { %2590 = vst [vmem:[#allocation89_spill] sm:$0xff] %v2137_v59  ;;  %v2163_v59 = vld [vmem:[#allocation12 + $0x258] sm:$0xff]  ;;  %699 = vmatpush.msrb.mxu3 %v2157_v58 }
  0x9d   : > { %2591 = vst [vmem:[#allocation90_spill] sm:$0xff] %v2141_v56  ;;  %v2161_v56 = vld [vmem:[#allocation12 + $0x58] sm:$0xff]  ;;  %739 = vmatpush.msra.mxu1 %v2163_v59  ;;  %680 = vmatpush.msrb.mxu2 %v2165_v60 }
  0x9e   : > { %2592 = vst [vmem:[#allocation91_spill] sm:$0xff] %v2145_v63  ;;  %v2171_v63 = vld [vmem:[#allocation12 + $0x38] sm:$0xff]  ;;  %719 = vmatpush.msra.mxu0 %v2161_v56 }
  0x9f   : > { %2593 = vst [vmem:[#allocation92_spill] sm:$0xff] %v2147_v11  ;;  %v2169_v11 = vld [vmem:[#allocation12 + $0x230] sm:$0xff]  ;;  %740 = vmatpush.msra.mxu1 %v2173_v55 }
  0xa0   : > { %2594 = vst [vmem:[#allocation93_spill] sm:$0xff] %v2149_v61  ;;  %v2179_v61 = vld [vmem:[#allocation12 + $0x210] sm:$0xff]  ;;  %700 = vmatpush.msrb.mxu3 %v2169_v11  ;;  %720 = vmatpush.msra.mxu0 %v2171_v63 }
  0xa1   : > { %2595 = vst [vmem:[#allocation94_spill] sm:$0xff] %v2153_v62  ;;  %v2177_v62 = vld [vmem:[#allocation12 + $0x10] sm:$0xff] }
  0xa2   : > { %2596 = vst [vmem:[#allocation95_spill] sm:$0xff] %v2155_v57  ;;  %v2183_v57 = vld [vmem:[#allocation12 + $0x18] sm:$0xff]  ;;  %681 = vmatpush.msrb.mxu2 %v2177_v62  ;;  %701 = vmatpush.msrb.mxu3 %v2179_v61 }
  0xa3   : > { %2597 = vst [vmem:[#allocation96_spill] sm:$0xff] %v2157_v58  ;;  %v2185_v58 = vld [vmem:[#allocation12 + $0x218] sm:$0xff]  ;;  %721 = vmatpush.msra.mxu0 %v2183_v57 }
  0xa4   : > { %2598 = vst [vmem:[#allocation97_spill] sm:$0xff] %v2161_v56  ;;  %741 = vmatpush.msra.mxu1 %v2185_v58 }
  0xa5   : > { %2599 = vst [vmem:[#allocation98_spill] sm:$0xff] %v2163_v59  ;;  %v2193_v59 = vld [vmem:[#allocation10] sm:$0x3] }
  0xa6   : > { %2600 = vst [vmem:[#allocation99_spill] sm:$0xff] %v2165_v60  ;;  %v528_v60 = vperm.slane %v2193_v59, 1 }
  0xa7   : > { %2601 = vst [vmem:[#allocation100_spill] sm:$0xff] %v2169_v11  ;;  %v527_v11 = vperm.slane %v2193_v59, 0 }
  0xa8   : > { %2602 = vst [vmem:[#allocation101_spill] sm:$0xff] %v2171_v63 }
  0xa9   : > { %2603 = vst [vmem:[#allocation102_spill] sm:$0xff] %v2173_v55 }
  0xaa   : > { %2604 = vst [vmem:[#allocation103_spill] sm:$0xff] %v2177_v62 }
  0xab   : > { %2605 = vst [vmem:[#allocation104_spill] sm:$0xff] %v2179_v61 }
  0xc6   : > { %v552_v56 = vpop.f32.mrf.mxu0 }
  0xc7   : > { %v572_v54 = vpop.f32.mrf.mxu1  ;;  %v553_v63 = vadd.f32 %v552_v56, %v527_v11  ;;  %v2660_v56 = vld [vmem:[#allocation78_spill] sm:$0xff] }
  0xc8   : > { %v573_v62 = vadd.f32 %v572_v54, %v528_v60  ;;  %v2658_v54 = vld [vmem:[#allocation76_spill] sm:$0xff] }
  0xc9   : > { %v575_v55 = vmax.f32 %v553_v63, 0.0  ;;  %v2663_v63 = vld [vmem:[#allocation81_spill] sm:$0xff] }
  0xca   : > { %v576_v61 = vmax.f32 %v573_v62, 0.0  ;;  %v2662_v62 = vld [vmem:[#allocation80_spill] sm:$0xff] }
  0xcb   : > { %602 = vmatmul.f32.vlgmr.msra.gmra.mxu2 %v575_v55  ;;  %642 = vmatmul.f32.vlgmr.msrb.gmra.mxu0 %v575_v55 }
  0xcc   : > { %622 = vmatmul.f32.vlgmr.msra.gmra.mxu3 %v576_v61  ;;  %662 = vmatmul.f32.vlgmr.msrb.gmra.mxu1 %v576_v61 }
  0xcd   : > { %765 = vmatpush.msra.mxu2 %v1777_v0  ;;  %785 = vmatpush.msra.mxu3 %v1779_v1  ;;  %v2221_v0 = vld [vmem:[%s323_s25] sm:$0xff] }
  0xce   : > { %795 = vmatpush.msrb.mxu0 %v1793_v6  ;;  %815 = vmatpush.msrb.mxu1 %v1795_v7  ;;  %v2606_v1 = vld [vmem:[#allocation24_spill] sm:$0xff]  ;;  %v2611_v6 = vld [vmem:[#allocation29_spill] sm:$0xff]  ;;  %v2612_v7 = vld [vmem:[#allocation30_spill] sm:$0xff] }
  0xcf   : > { %766 = vmatpush.msra.mxu2 %v1781_v2  ;;  %786 = vmatpush.msra.mxu3 %v1785_v3  ;;  %v2607_v2 = vld [vmem:[#allocation25_spill] sm:$0xff]  ;;  %v2608_v3 = vld [vmem:[#allocation26_spill] sm:$0xff] }
  0xd0   : > { %796 = vmatpush.msrb.mxu0 %v1803_v10  ;;  %816 = vmatpush.msrb.mxu1 %v1811_v12  ;;  %v2615_v10 = vld [vmem:[#allocation33_spill] sm:$0xff]  ;;  %v2616_v12 = vld [vmem:[#allocation34_spill] sm:$0xff] }
  0xd1   : > { %767 = vmatpush.msra.mxu2 %v1787_v4  ;;  %787 = vmatpush.msra.mxu3 %v1789_v5  ;;  %v2609_v4 = vld [vmem:[#allocation27_spill] sm:$0xff]  ;;  %v2610_v5 = vld [vmem:[#allocation28_spill] sm:$0xff] }
  0xd2   : > { %797 = vmatpush.msrb.mxu0 %v1821_v15  ;;  %817 = vmatpush.msrb.mxu1 %v1823_v16  ;;  %v2619_v15 = vld [vmem:[#allocation37_spill] sm:$0xff]  ;;  %v2620_v16 = vld [vmem:[#allocation38_spill] sm:$0xff] }
  0xd3   : > { %682 = vmatmul.f32.vlgmr.msrb.gmra.mxu2 %v575_v55  ;;  %722 = vmatmul.f32.vlgmr.msra.gmra.mxu0 %v575_v55  ;;  %v2659_v55 = vld [vmem:[#allocation77_spill] sm:$0xff] }
  0xd4   : > { %702 = vmatmul.f32.vlgmr.msrb.gmra.mxu3 %v576_v61  ;;  %742 = vmatmul.f32.vlgmr.msra.gmra.mxu1 %v576_v61  ;;  %v2661_v61 = vld [vmem:[#allocation79_spill] sm:$0xff] }
  0xd5   : > { %768 = vmatpush.msra.mxu2 %v1797_v8  ;;  %788 = vmatpush.msra.mxu3 %v1799_v9  ;;  %v2613_v8 = vld [vmem:[#allocation31_spill] sm:$0xff]  ;;  %v2614_v9 = vld [vmem:[#allocation32_spill] sm:$0xff] }
  0xd6   : > { %798 = vmatpush.msrb.mxu0 %v1835_v19  ;;  %818 = vmatpush.msrb.mxu1 %v1837_v20  ;;  %v2623_v19 = vld [vmem:[#allocation41_spill] sm:$0xff]  ;;  %v2624_v20 = vld [vmem:[#allocation42_spill] sm:$0xff] }
  0xd7   : > { %835 = vmatpush.msrb.mxu2 %v1813_v13  ;;  %855 = vmatpush.msrb.mxu3 %v1815_v14  ;;  %v2617_v13 = vld [vmem:[#allocation35_spill] sm:$0xff]  ;;  %v2618_v14 = vld [vmem:[#allocation36_spill] sm:$0xff] }
  0xd8   : > { %799 = vmatpush.msrb.mxu0 %v1847_v23  ;;  %819 = vmatpush.msrb.mxu1 %v1849_v24  ;;  %v2627_v23 = vld [vmem:[#allocation45_spill] sm:$0xff]  ;;  %v2628_v24 = vld [vmem:[#allocation46_spill] sm:$0xff] }
  0xd9   : > { %836 = vmatpush.msrb.mxu2 %v1829_v17  ;;  %856 = vmatpush.msrb.mxu3 %v1831_v18  ;;  %v2621_v17 = vld [vmem:[#allocation39_spill] sm:$0xff]  ;;  %v2622_v18 = vld [vmem:[#allocation40_spill] sm:$0xff] }
  0xda   : > { %800 = vmatpush.msrb.mxu0 %v1859_v27  ;;  %820 = vmatpush.msrb.mxu1 %v1861_v28  ;;  %v2631_v27 = vld [vmem:[#allocation49_spill] sm:$0xff]  ;;  %v2632_v28 = vld [vmem:[#allocation50_spill] sm:$0xff] }
  0xdb   : > { %837 = vmatpush.msrb.mxu2 %v1841_v21  ;;  %857 = vmatpush.msrb.mxu3 %v1843_v22  ;;  %v2625_v21 = vld [vmem:[#allocation43_spill] sm:$0xff]  ;;  %v2626_v22 = vld [vmem:[#allocation44_spill] sm:$0xff] }
  0xdc   : > { %1237 = vmatmul.msk.f32.vlgmr.msra.gmra.mxu2 %vm531_vm0, %v2221_v0  ;;  %1238 = vmatmul.msk.f32.vlgmr.msra.gmra.mxu3 %vm531_vm0, %v2221_v0 }
  0xdd   : > { %838 = vmatpush.msrb.mxu2 %v1853_v25  ;;  %858 = vmatpush.msrb.mxu3 %v1855_v26  ;;  %v2629_v25 = vld [vmem:[#allocation47_spill] sm:$0xff]  ;;  %v2630_v26 = vld [vmem:[#allocation48_spill] sm:$0xff] }
  0xde   : > { %801 = vmatpush.msrb.mxu0 %v1871_v31  ;;  %821 = vmatpush.msrb.mxu1 %v1873_v32  ;;  %v2635_v31 = vld [vmem:[#allocation53_spill] sm:$0xff]  ;;  %v2636_v32 = vld [vmem:[#allocation54_spill] sm:$0xff] }
  0xdf   : > { %839 = vmatpush.msrb.mxu2 %v1865_v29  ;;  %859 = vmatpush.msrb.mxu3 %v1867_v30  ;;  %v2633_v29 = vld [vmem:[#allocation51_spill] sm:$0xff]  ;;  %v2634_v30 = vld [vmem:[#allocation52_spill] sm:$0xff] }
  0xe0   : > { %802 = vmatpush.msrb.mxu0 %v1883_v35  ;;  %822 = vmatpush.msrb.mxu1 %v1885_v36  ;;  %v2639_v35 = vld [vmem:[#allocation57_spill] sm:$0xff]  ;;  %v2640_v36 = vld [vmem:[#allocation58_spill] sm:$0xff] }
  0xe1   : > { %840 = vmatpush.msrb.mxu2 %v1877_v33  ;;  %860 = vmatpush.msrb.mxu3 %v1879_v34  ;;  %v2637_v33 = vld [vmem:[#allocation55_spill] sm:$0xff]  ;;  %v2638_v34 = vld [vmem:[#allocation56_spill] sm:$0xff] }
  0xe2   : > { %803 = vmatpush.msrb.mxu0 %v1895_v39  ;;  %823 = vmatpush.msrb.mxu1 %v1897_v40  ;;  %v2643_v39 = vld [vmem:[#allocation61_spill] sm:$0xff]  ;;  %v2644_v40 = vld [vmem:[#allocation62_spill] sm:$0xff] }
  0xe3   : > { %841 = vmatpush.msrb.mxu2 %v1889_v37  ;;  %861 = vmatpush.msrb.mxu3 %v1891_v38  ;;  %v2641_v37 = vld [vmem:[#allocation59_spill] sm:$0xff]  ;;  %v2642_v38 = vld [vmem:[#allocation60_spill] sm:$0xff] }
  0xe4   : > { %804 = vmatpush.msrb.mxu0 %v1907_v43  ;;  %824 = vmatpush.msrb.mxu1 %v1909_v44  ;;  %v2647_v43 = vld [vmem:[#allocation65_spill] sm:$0xff]  ;;  %v2648_v44 = vld [vmem:[#allocation66_spill] sm:$0xff] }
  0xe5   : > { %842 = vmatpush.msrb.mxu2 %v1901_v41  ;;  %862 = vmatpush.msrb.mxu3 %v1903_v42  ;;  %v2645_v41 = vld [vmem:[#allocation63_spill] sm:$0xff]  ;;  %v2646_v42 = vld [vmem:[#allocation64_spill] sm:$0xff] }
  0xe6   : > { %805 = vmatpush.msrb.mxu0 %v1919_v47  ;;  %825 = vmatpush.msrb.mxu1 %v1921_v48  ;;  %v2651_v47 = vld [vmem:[#allocation69_spill] sm:$0xff]  ;;  %v2652_v48 = vld [vmem:[#allocation70_spill] sm:$0xff] }
  0xe7   : > { %843 = vmatpush.msrb.mxu2 %v1913_v45  ;;  %863 = vmatpush.msrb.mxu3 %v1915_v46  ;;  %v2649_v45 = vld [vmem:[#allocation67_spill] sm:$0xff]  ;;  %v2650_v46 = vld [vmem:[#allocation68_spill] sm:$0xff] }
  0xe8   : > { %806 = vmatpush.msrb.mxu0 %v1931_v51  ;;  %826 = vmatpush.msrb.mxu1 %v1933_v52  ;;  %v2655_v51 = vld [vmem:[#allocation73_spill] sm:$0xff]  ;;  %v2656_v52 = vld [vmem:[#allocation74_spill] sm:$0xff] }
  0xe9   : > { %844 = vmatpush.msrb.mxu2 %v1925_v49  ;;  %864 = vmatpush.msrb.mxu3 %v1927_v50  ;;  %v2653_v49 = vld [vmem:[#allocation71_spill] sm:$0xff]  ;;  %v2654_v50 = vld [vmem:[#allocation72_spill] sm:$0xff] }
  0xea   : > { %807 = vmatpush.msrb.mxu0 %v2607_v2  ;;  %827 = vmatpush.msrb.mxu1 %v2608_v3  ;;  %v2665_v2 = vld [vmem:[#allocation83_spill] sm:$0xff]  ;;  %v2666_v3 = vld [vmem:[#allocation84_spill] sm:$0xff] }
  0xeb   : > { %845 = vmatpush.msrb.mxu2 %v1937_v53  ;;  %865 = vmatpush.msrb.mxu3 %v2606_v1  ;;  %v2657_v53 = vld [vmem:[#allocation75_spill] sm:$0xff]  ;;  %v2664_v1 = vld [vmem:[#allocation82_spill] sm:$0xff] }
  0xec   : > { %808 = vmatpush.msrb.mxu0 %v2611_v6  ;;  %828 = vmatpush.msrb.mxu1 %v2612_v7  ;;  %v2669_v6 = vld [vmem:[#allocation87_spill] sm:$0xff]  ;;  %v2670_v7 = vld [vmem:[#allocation88_spill] sm:$0xff] }
  0xed   : > { %846 = vmatpush.msrb.mxu2 %v2609_v4  ;;  %866 = vmatpush.msrb.mxu3 %v2610_v5  ;;  %v2667_v4 = vld [vmem:[#allocation85_spill] sm:$0xff]  ;;  %v2668_v5 = vld [vmem:[#allocation86_spill] sm:$0xff] }
  0xee   : > { %809 = vmatpush.msrb.mxu0 %v2615_v10  ;;  %829 = vmatpush.msrb.mxu1 %v2616_v12  ;;  %v2673_v10 = vld [vmem:[#allocation91_spill] sm:$0xff]  ;;  %v2674_v12 = vld [vmem:[#allocation92_spill] sm:$0xff] }
  0xef   : > { %847 = vmatpush.msrb.mxu2 %v2613_v8  ;;  %867 = vmatpush.msrb.mxu3 %v2614_v9  ;;  %v2671_v8 = vld [vmem:[#allocation89_spill] sm:$0xff]  ;;  %v2672_v9 = vld [vmem:[#allocation90_spill] sm:$0xff] }
  0xf0   : > { %810 = vmatpush.msrb.mxu0 %v2619_v15  ;;  %830 = vmatpush.msrb.mxu1 %v2620_v16  ;;  %v2677_v15 = vld [vmem:[#allocation95_spill] sm:$0xff]  ;;  %v2678_v16 = vld [vmem:[#allocation96_spill] sm:$0xff] }
  0xf1   : > { %848 = vmatpush.msrb.mxu2 %v2617_v13  ;;  %868 = vmatpush.msrb.mxu3 %v2618_v14  ;;  %v2675_v13 = vld [vmem:[#allocation93_spill] sm:$0xff]  ;;  %v2676_v14 = vld [vmem:[#allocation94_spill] sm:$0xff] }
  0xf2   : > { %875 = vmatpush.msra.mxu0 %v2623_v19  ;;  %895 = vmatpush.msra.mxu1 %v2624_v20  ;;  %v2681_v19 = vld [vmem:[#allocation99_spill] sm:$0xff]  ;;  %v2682_v20 = vld [vmem:[#allocation100_spill] sm:$0xff] }
  0xf3   : > { %849 = vmatpush.msrb.mxu2 %v2621_v17  ;;  %869 = vmatpush.msrb.mxu3 %v2622_v18  ;;  %v2679_v17 = vld [vmem:[#allocation97_spill] sm:$0xff]  ;;  %v2680_v18 = vld [vmem:[#allocation98_spill] sm:$0xff] }
  0xf4   : > { %876 = vmatpush.msra.mxu0 %v2629_v25  ;;  %896 = vmatpush.msra.mxu1 %v2630_v26  ;;  %v2348_v25 = vld [vmem:[%s2421_s5] sm:$0xf] }
  0xf5   : > { %850 = vmatpush.msrb.mxu2 %v2625_v21  ;;  %870 = vmatpush.msrb.mxu3 %v2626_v22  ;;  %v2683_v21 = vld [vmem:[#allocation101_spill] sm:$0xff]  ;;  %v2684_v22 = vld [vmem:[#allocation102_spill] sm:$0xff]  ;;  %v578_v26 = vperm.slane %v2348_v25, 0 }
  0xf6   : > { %877 = vmatpush.msra.mxu0 %v2633_v29  ;;  %897 = vmatpush.msra.mxu1 %v2634_v30 }
  0xf7   : > { %915 = vmatpush.msra.mxu2 %v2627_v23  ;;  %935 = vmatpush.msra.mxu3 %v2628_v24  ;;  %v2685_v23 = vld [vmem:[#allocation103_spill] sm:$0xff]  ;;  %v2686_v24 = vld [vmem:[#allocation104_spill] sm:$0xff] }
  0xf8   : > { %878 = vmatpush.msra.mxu0 %v2637_v33  ;;  %898 = vmatpush.msra.mxu1 %v2638_v34 }
  0xf9   : > { %916 = vmatpush.msra.mxu2 %v2631_v27  ;;  %936 = vmatpush.msra.mxu3 %v2632_v28 }
  0xfa   : > { %879 = vmatpush.msra.mxu0 %v2641_v37  ;;  %899 = vmatpush.msra.mxu1 %v2642_v38 }
  0xfb   : > { %917 = vmatpush.msra.mxu2 %v2635_v31  ;;  %937 = vmatpush.msra.mxu3 %v2636_v32  ;;  %v580_v31 = vperm.slane %v2348_v25, 2 }
  0xfc   : > { %880 = vmatpush.msra.mxu0 %v2645_v41  ;;  %900 = vmatpush.msra.mxu1 %v2646_v42  ;;  %v2687_v42 = vld [vmem:[#allocation23_spill] sm:$0xff] }
  0xfd   : > { %918 = vmatpush.msra.mxu2 %v2639_v35  ;;  %938 = vmatpush.msra.mxu3 %v2640_v36 }
  0xfe   : > { %881 = vmatpush.msra.mxu0 %v2649_v45  ;;  %901 = vmatpush.msra.mxu1 %v2650_v46  ;;  %v579_v46 = vperm.slane %v2348_v25, 1 }
  0xff   : > { %919 = vmatpush.msra.mxu2 %v2643_v39  ;;  %939 = vmatpush.msra.mxu3 %v2644_v40 }
 0x100   : > { %882 = vmatpush.msra.mxu0 %v2653_v49  ;;  %902 = vmatpush.msra.mxu1 %v2654_v50 }
 0x101   : > { %920 = vmatpush.msra.mxu2 %v2647_v43  ;;  %940 = vmatpush.msra.mxu3 %v2648_v44  ;;  %v963_v43 = vsub.f32 %v2687_v42, %v2221_v0 }
 0x102   : > { %883 = vmatpush.msra.mxu0 %v2657_v53  ;;  %903 = vmatpush.msra.mxu1 %v2658_v54 }
 0x103   : > { %921 = vmatpush.msra.mxu2 %v2651_v47  ;;  %941 = vmatpush.msra.mxu3 %v2652_v48  ;;  %v1014_v45 = vmul.f32 %v963_v43, %v963_v43 }
 0x104   : > { %884 = vmatpush.msra.mxu0 %v2661_v61  ;;  %904 = vmatpush.msra.mxu1 %v2662_v62 }
 0x105   : > { %922 = vmatpush.msra.mxu2 %v2655_v51  ;;  %942 = vmatpush.msra.mxu3 %v2656_v52  ;;  %v1015_v59 = vsel %vm531_vm0, %v1014_v45, 0.0  ;;  %v1603_v52 = vmov 0.0  }
 0x106   : > { %885 = vmatpush.msra.mxu0 %v2665_v2  ;;  %905 = vmatpush.msra.mxu1 %v2666_v3  ;;  %v1016_v51 = vrot.slane %v1015_v59, 4  ;;  %385 = vst.msk [vmem:[#allocation3] sm:$0x1] %vm384_vm2, %v1603_v52 }
 0x107   : > { %923 = vmatpush.msra.mxu2 %v2659_v55  ;;  %943 = vmatpush.msra.mxu3 %v2660_v56 }
 0x108   : > { %886 = vmatpush.msra.mxu0 %v2669_v6  ;;  %906 = vmatpush.msra.mxu1 %v2670_v7  ;;  %v1017_v54 = vadd.f32 %v1016_v51, %v1015_v59 }
 0x109   : > { %924 = vmatpush.msra.mxu2 %v2663_v63  ;;  %944 = vmatpush.msra.mxu3 %v2664_v1  ;;  %v581_v1 = vperm.slane %v2348_v25, 3 }
 0x10a   : > { %887 = vmatpush.msra.mxu0 %v2673_v10  ;;  %907 = vmatpush.msra.mxu1 %v2674_v12 }
 0x10b   : > { %925 = vmatpush.msra.mxu2 %v2667_v4  ;;  %945 = vmatpush.msra.mxu3 %v2668_v5  ;;  %v1018_v5 = vrot.slane %v1017_v54, 2 }
 0x10c   : > { %888 = vmatpush.msra.mxu0 %v2677_v15  ;;  %908 = vmatpush.msra.mxu1 %v2678_v16 }
 0x10d   : > { %926 = vmatpush.msra.mxu2 %v2671_v8  ;;  %946 = vmatpush.msra.mxu3 %v2672_v9  ;;  %v1019_v16 = vadd.f32 %v1018_v5, %v1017_v54 }
 0x10e   : > { %889 = vmatpush.msra.mxu0 %v2681_v19  ;;  %909 = vmatpush.msra.mxu1 %v2682_v20 }
 0x10f   : > { %927 = vmatpush.msra.mxu2 %v2675_v13  ;;  %947 = vmatpush.msra.mxu3 %v2676_v14 }
 0x110   : > { %890 = vmatpush.msra.mxu0 %v2685_v23  ;;  %910 = vmatpush.msra.mxu1 %v2686_v24 }
 0x111   : > { %928 = vmatpush.msra.mxu2 %v2679_v17  ;;  %948 = vmatpush.msra.mxu3 %v2680_v18 }
 0x113   : > { %929 = vmatpush.msra.mxu2 %v2683_v21  ;;  %949 = vmatpush.msra.mxu3 %v2684_v22 }
 0x115   : > { %930 = vmatpush.msra.mxu2 %v2183_v57  ;;  %950 = vmatpush.msra.mxu3 %v2185_v58 }
 0x148   : > { %v643_v40 = vpop.f32.mrf.mxu0 }
 0x149   : > { %v663_v41 = vpop.f32.mrf.mxu1  ;;  %v644_v53 = vadd.f32 %v643_v40, %v579_v46  ;;  %v1013_v40 = vld [vmem:[#allocation3] sm:$0x1] }
 0x14b   : > { %v664_v62 = vadd.f32 %v663_v41, %v644_v53 }
 0x14d   : > { %v747_v10 = vmax.f32 %v664_v62, 0.0 }
 0x14e   : > { %v603_v27 = vpop.f32.mrf.mxu2 }
 0x14f   : > { %v623_v28 = vpop.f32.mrf.mxu3  ;;  %v604_v29 = vadd.f32 %v603_v27, %v578_v26 }
 0x150   : > { %v723_v44 = vpop.f32.mrf.mxu0 }
 0x151   : > { %v624_v30 = vadd.f32 %v623_v28, %v604_v29  ;;  %v724_v12 = vadd.f32 %v723_v44, %v581_v1 }
 0x153   : > { %v746_v63 = vmax.f32 %v624_v30, 0.0 }
 0x156   : > { %v683_v32 = vpop.f32.mrf.mxu2 }
 0x157   : > { %v703_v33 = vpop.f32.mrf.mxu3  ;;  %v684_v34 = vadd.f32 %v683_v32, %v580_v31 }
 0x159   : > { %v704_v35 = vadd.f32 %v703_v33, %v684_v34 }
 0x15b   : > { %v748_v14 = vmax.f32 %v704_v35, 0.0 }
 0x15f   : > { %v770_v57 = vpop.f32.mrf.mxu2  ;;  %v790_v36 = vpop.f32.mrf.mxu3 }
 0x160   : > { %v771_v58 = vadd.f32 %v770_v57, %v527_v11  ;;  %v791_v37 = vadd.f32 %v790_v36, %v528_v60  ;;  %v743_v11 = vpop.f32.mrf.mxu1  ;;  %v379_v60 = vlaneseq }
 0x161   : > { %v744_v21 = vadd.f32 %v743_v11, %v724_v12 }
 0x162   : > { %v793_v38 = vmax.f32 %v771_v58, 0.0  ;;  %v794_v39 = vmax.f32 %v791_v37, 0.0  ;;  %vm2360_vm1 = vcmp.lt.s32.totalorder %v379_v60, 512 }
 0x163   : > { %383 = vst.msk [vmem:[#allocation2] sm:$0xf] %vm2360_vm1, %v1603_v52 }
 0x164   : > { %811 = vmatmul.f32.vlgmr.msrb.gmra.mxu0 %v793_v38  ;;  %831 = vmatmul.f32.vlgmr.msrb.gmra.mxu1 %v794_v39 }
 0x165   : > { %851 = vmatmul.f32.vlgmr.msrb.gmra.mxu2 %v793_v38  ;;  %871 = vmatmul.f32.vlgmr.msrb.gmra.mxu3 %v794_v39 }
 0x16c   : > { %891 = vmatmul.f32.vlgmr.msra.gmra.mxu0 %v793_v38  ;;  %911 = vmatmul.f32.vlgmr.msra.gmra.mxu1 %v794_v39 }
 0x16d   : > { %931 = vmatmul.f32.vlgmr.msra.gmra.mxu2 %v793_v38  ;;  %951 = vmatmul.f32.vlgmr.msra.gmra.mxu3 %v794_v39 }
 0x1e1   : > { %v812_v47 = vpop.f32.mrf.mxu0  ;;  %v832_v48 = vpop.f32.mrf.mxu1 }
 0x1e2   : > { %v813_v49 = vadd.f32 %v812_v47, %v578_v26  ;;  %v1020_v26 = vrot.slane %v1019_v16, 1 }
 0x1e4   : > { %v833_v0 = vadd.f32 %v832_v48, %v813_v49  ;;  %v1021_v35 = vadd.f32 %v1020_v26, %v1019_v16 }
 0x1e6   : > { %v955_v55 = vmax.f32 %v833_v0, 0.0  ;;  %v1022_v44 = vadd.f32 %v1021_v35, %v1013_v40 }
 0x1e8   : > { %v852_v56 = vpop.f32.mrf.mxu2  ;;  %v872_v61 = vpop.f32.mrf.mxu3  ;;  %v959_v6 = vsub.f32 %v746_v63, %v955_v55  ;;  %1024 = vst.msk [vmem:[#allocation3] sm:$0x1] %vm384_vm2, %v1022_v44 }
 0x1e9   : > { %v853_v2 = vadd.f32 %v852_v56, %v579_v46  ;;  %v892_v3 = vpop.f32.mrf.mxu0  ;;  %v912_v8 = vpop.f32.mrf.mxu1 }
 0x1ea   : > { %v893_v4 = vadd.f32 %v892_v3, %v580_v31  ;;  %v965_v17 = vmul.f32 %v959_v6, %v959_v6  ;;  %v749_v31 = vmax.f32 %v744_v21, 0.0 }
 0x1eb   : > { %v873_v7 = vadd.f32 %v872_v61, %v853_v2  ;;  %v964_v61 = vld [vmem:[#allocation2] sm:$0xf] }
 0x1ec   : > { %v913_v9 = vadd.f32 %v912_v8, %v893_v4  ;;  %v969_v27 = vrot.slane %v965_v17, 4 }
 0x1ed   : > { %v956_v13 = vmax.f32 %v873_v7, 0.0 }
 0x1ee   : > { %v957_v15 = vmax.f32 %v913_v9, 0.0  ;;  %v970_v57 = vadd.f32 %v969_v27, %v965_v17 }
 0x1ef   : > { %v960_v18 = vsub.f32 %v747_v10, %v956_v13  ;;  %v1055_v16 = vld [vmem:[#allocation3] sm:$0x1] }
 0x1f0   : > { %v961_v19 = vsub.f32 %v748_v14, %v957_v15  ;;  %v932_v20 = vpop.f32.mrf.mxu2  ;;  %v952_v25 = vpop.f32.mrf.mxu3  ;;  %v971_v41 = vrot.slane %v970_v57, 2  ;;  %v1056_v50 = vsel %vm384_vm2, %v1055_v16, 0.0 }
 0x1f1   : > { %v966_v22 = vmul.f32 %v960_v18, %v960_v18  ;;  %v933_v23 = vadd.f32 %v932_v20, %v581_v1 }
 0x1f2   : > { %v967_v24 = vmul.f32 %v961_v19, %v961_v19  ;;  %v972_v59 = vadd.f32 %v971_v41, %v970_v57 }
 0x1f3   : > { %v975_v28 = vrot.slane %v966_v22, 4  ;;  %v953_v29 = vadd.f32 %v952_v25, %v933_v23 }
 0x1f4   : > { %v981_v30 = vrot.slane %v967_v24, 4  ;;  %v973_v49 = vrot.slane %v972_v59, 1 }
 0x1f5   : > { %v976_v32 = vadd.f32 %v975_v28, %v966_v22  ;;  %v958_v33 = vmax.f32 %v953_v29, 0.0 }
 0x1f6   : > { %v982_v34 = vadd.f32 %v981_v30, %v967_v24  ;;  %v974_v54 = vadd.f32 %v973_v49, %v972_v59 }
 0x1f7   : > { %v977_v36 = vrot.slane %v976_v32, 2  ;;  %v962_v58 = vsub.f32 %v749_v31, %v958_v33 }
 0x1f8   : > { %v983_v37 = vrot.slane %v982_v34, 2 }
 0x1f9   : > { %v978_v38 = vadd.f32 %v977_v36, %v976_v32  ;;  %v968_v39 = vmul.f32 %v962_v58, %v962_v58 }
 0x1fa   : > { %v984_v42 = vadd.f32 %v983_v37, %v982_v34 }
 0x1fb   : > { %v987_v43 = vrot.slane %v968_v39, 4  ;;  %v979_v11 = vrot.slane %v978_v38, 1 }
 0x1fc   : > { %v985_v60 = vrot.slane %v984_v42, 1 }
 0x1fd   : > { %v988_v45 = vadd.f32 %v987_v43, %v968_v39  ;;  %v980_v47 = vadd.f32 %v979_v11, %v978_v38 }
 0x1fe   : > { %v986_v51 = vadd.f32 %v985_v60, %v984_v42 }
 0x1ff   : > { %v989_v46 = vrot.slane %v988_v45, 2  ;;  %v997_v0 = vrot.slane %v980_v47, 7 }
 0x200   : > { %v998_v55 = vrot.slane %v986_v51, 6 }
 0x201   : > { %v990_v48 = vadd.f32 %v989_v46, %v988_v45  ;;  %v1001_v63 = vsel %vm1000_vm4, %v974_v54, %v997_v0 }
 0x203   : > { %v991_v52 = vrot.slane %v990_v48, 1 }
 0x205   : > { %v992_v53 = vadd.f32 %v991_v52, %v990_v48 }
 0x207   : > { %v999_v56 = vrot.slane %v992_v53, 5 }
 0x209   : > { %v1003_v62 = vsel %vm1002_vm3, %v998_v55, %v999_v56 }
 0x20a   : > { %v1005_v1 = vsel %vm1004_vm5, %v1001_v63, %v1003_v62 }
 0x20b   : > { %v1007_v2 = vadd.f32 %v1005_v1, %v964_v61 }
 0x20d   : > { %1012 = vst.msk [vmem:[#allocation2] sm:$0xf] %vm2360_vm1, %v1007_v2 }
 0x214   : > { %v1028_v3 = vld [vmem:[#allocation2] sm:$0xf] }
 0x215   : > { %v1030_v4 = vperm.slane %v1028_v3, 0  ;;  %v1031_v5 = vperm.slane %v1028_v3, 1  ;;  %v1032_v6 = vperm.slane %v1028_v3, 2  ;;  %v1033_v7 = vperm.slane %v1028_v3, 3 }
 0x217   : > { %v1038_v8 = vsel %vm1000_vm4, %v1030_v4, 0.0  ;;  %v1039_v9 = vsel %vm1000_vm4, %v1031_v5, 0.0  ;;  %v1041_v12 = vsel %vm1000_vm4, %v1032_v6, 0.0  ;;  %v1043_v14 = vsel %vm1000_vm4, %v1033_v7, 0.0 }
 0x218   : > { %v1040_v10 = vadd.f32 %v1039_v9, %v1038_v8 }
 0x21a   : > { %v1042_v13 = vadd.f32 %v1041_v12, %v1040_v10 }
 0x21c   : > { %v1044_v15 = vadd.f32 %v1043_v14, %v1042_v13 }
 0x21e   : > { %1045 = vadd.xlane.f32.xlu0 %v1044_v15 }
 0x226   : > { %1057 = vadd.xlane.f32.xlu0 %v1056_v50 }
 0x291   : > { %v1046_v17 = vpop.xlane.xlu0 %1045 }
 0x292   : > { %v1047_v18 = vrot.slane %v1046_v17, 4 }
 0x294   : > { %v1048_v19 = vadd.f32 %v1047_v18, %v1046_v17 }
 0x296   : > { %v1049_v20 = vrot.slane %v1048_v19, 2 }
 0x298   : > { %v1050_v21 = vadd.f32 %v1049_v20, %v1048_v19 }
 0x299   : > { %v1058_v22 = vpop.xlane.xlu0 %1057 }
 0x29a   : > { %v1059_v23 = vrot.slane %v1058_v22, 4  ;;  %v1051_v24 = vrot.slane %v1050_v21, 1 }
 0x29c   : > { %v1060_v25 = vadd.f32 %v1059_v23, %v1058_v22  ;;  %v1052_v26 = vadd.f32 %v1051_v24, %v1050_v21 }
 0x29e   : > { %v1061_v27 = vrot.slane %v1060_v25, 2  ;;  %1243 = vpush %v1052_v26 }
 0x2a0   : > { %v1062_v28 = vadd.f32 %v1061_v27, %v1060_v25 }
 0x2a2   : > { %v1063_v29 = vrot.slane %v1062_v28, 1 }
 0x2a4   : > { %v1064_v30 = vadd.f32 %v1063_v29, %v1062_v28 }
 0x2a6   : > { %1245 = vpush %v1064_v30 }
 0x2cf   : > { %s1244_s16 = spop %1243 }
 0x2d0   : > { %s1054_s8 = smul.f32 0.0009765625, %s1244_s16 }
 0x2d7   : > { %s1246_s9 = spop %1245 }
 0x2d8   : > { %s1066_s14 = smul.f32 0.015625, %s1246_s9 }
 0x2da   : > { %s1067_s28 = sadd.f32 %s1066_s14, %s1054_s8 }
 0x2dc   : > { %v1068_v31 = vstv %s1067_s28 }
 0x2dd   : > { %1069 = vst [vmem:[%s372_s29] sm:$0xff] %v1068_v31 }
 0x2de   : > { %1527 = shalt.err (!%p1524_p13)
}
 0x2df   : > { %1263 = dma.vmem_to_hbm [thread:$0]  (%p1726_p4), %s1084_s30, 128, %s1086_s12, %s1071_s11  }
 0x2e0 PF: > { %s1097_s13 = sand.u32 1, %s1574_s21   ;;  %p1283_p0 = pnand %p1223_p6, %p1734_p7 }
 0x2e1   : > { %s1098_s7 = scalar_lea.sflag [#allocation6], %s1097_s13 }
 0x2e2   : > { %p1284_p2 = pneg %p1283_p0 }
 0x2e4   : > { %1569 = dma.done.wait (%p1284_p2), %s1098_s7, 128  }
 0x2e5   : > { %1571 = vsyncadd (%p1284_p2), %s1098_s7, 4294967168  ;;  %s26_s26 = sadd.s32 1, %s1594_s26   ;;  %s2690_s10 = sld [smem:[#allocation19_spill]] }
 0x2e6   : > { %p23_p5 = scmp.ge.s32.totalorder %s26_s26, 4   ;;  %s2691_s23 = sld [smem:[#allocation22_spill]] }
 0x2e7   : > { %s2692_s24 = sld [smem:[#allocation20_spill]]  ;;  %s2694_s21 = smov %s1578_s22 }
 0x2e8   : > { %s2693_s25 = sld [smem:[#allocation21_spill]]  ;;  %25 = sbr.rel (!%p23_p5) target bundleno = 13 (0xd), region = 122 }
 0x2eb   : > { %s2695_s22 = smov %s2690_s10 }
 0x2ed   :  { %1104 = vsyncpa [#allocation5], 1 }
 0x2ee   :  { %1106 = vsyncpa [#allocation5 + $0x1], 1 }
 0x2ef   :  { %1107 = vsyncpa [#allocation8], 1 }
 0x2f0   :  { %1109 = vsyncpa [#allocation8 + $0x1], 1 }
 0x2f1   :  { %1110 = vsyncpa [#allocation11], 1 }
 0x2f2   :  { %1111 = vsyncpa [#allocation6], 1 }
 0x2f3   :  { %1113 = vsyncpa [#allocation6 + $0x1], 1 }

</bundles_post_ra>
